<compile_context>
chip_gen: v7x
topology: tpu7x:2x2x1
jax: 0.10.0
libtpu: 0.0.40
codegen_flags: <defaults>
</compile_context>

<pallas_src>
import functools

import jax
import jax.numpy as jnp
from jax.experimental import pallas as pl
from jax.experimental.pallas import tpu as pltpu


def _downsample_kernel(x_ref, s_ref, w_ref, b_ref, o_ref, p_ref, *,
                       Bn, Cin, Cout, Hp, Wp, W, Wpad):
    # x_ref : (Bn, Cin*Hp, 2*W)    Bn batch images; row (c*Hp+hp) holds input rows 2hp|2hp+1 side by side
    # s_ref : (W, Wpad)            0.25 column-pair selector with conv left/right pad cols built in
    # w_ref : (Cout, 9*Cin)        conv weights, K ordered (kh, kw, c)
    # b_ref : (Cout, 1)            conv bias (f32)
    # o_ref : (Bn, Cout, Hp, Wp)   exact NCHW output block
    # p_ref : VMEM (Cin, (Hp+3)*Wpad)  flat zero-padded pooled image (reused for every image)
    f32 = jnp.float32
    L = Hp * Wpad
    mxu_dt = p_ref.dtype

    # ---- conv halo: zero ONLY the top pad band and the bottom pad + overread-guard bands ----
    # (re-done every grid step: scratch persists across steps, but a program_id==0 one-time init
    #  is not megacore-safe on the "parallel" batch axis.  Interior rows are written once below.)
    p_ref[:, 0:Wpad] = jnp.zeros((Cin, Wpad), mxu_dt)
    p_ref[:, (Hp + 1) * Wpad:(Hp + 3) * Wpad] = jnp.zeros((Cin, 2 * Wpad), mxu_dt)

    for b in range(Bn):
        # ---- AvgPool2d(kernel_size=2, stride=2) ----
        # row pairs: already adjacent lane halves thanks to the wrapper's free reshape.
        xb = x_ref[b]                                              # (Cin*Hp, 2W)
        rows = xb[:, :W].astype(f32) + xb[:, W:].astype(f32)       # (Cin*Hp, W)
        # column pairs + 0.25 scale + conv left/right zero-pad columns: one small matmul.
        # NOTE: for very large W apply this selector in 256-column block-diagonal chunks
        #       (keeps pool FLOPs linear in W instead of O(W*Wp)).
        pooled = jnp.dot(rows.astype(mxu_dt), s_ref[...],
                         preferred_element_type=f32)               # (Cin*Hp, Wpad)
        pooled = pooled.astype(mxu_dt).reshape(Cin, Hp, Wpad)      # leading-dim split, lanes untouched

        # ---- interior rows of the flat padded image: full Wpad-wide bands, written exactly once ----
        # NOTE: switch to lax.fori_loop(..., unroll=8) with pl.ds offsets if Hp grows into the 100s.
        for hp in range(Hp):
            p_ref[:, (hp + 1) * Wpad:(hp + 2) * Wpad] = pooled[:, hp, :]

        # ---- Conv2d(3x3, stride 1, pad 1): 9 direct MXU matmuls, no im2col materialization ----
        # each tap reads a *contiguous* lane slice of the flat padded image; K = Cin per tap.
        acc = jnp.dot(w_ref[:, 0:Cin], p_ref[:, 0:L],
                      preferred_element_type=f32)                  # tap (kh=0, kw=0)
        for t in range(1, 9):
            kh, kw = divmod(t, 3)
            off = kh * Wpad + kw
            acc = acc + jnp.dot(w_ref[:, t * Cin:(t + 1) * Cin],
                                p_ref[:, off:off + L],
                                preferred_element_type=f32)        # (Cout, L)
        acc = acc + b_ref[...]                                     # bias broadcast (Cout, 1)

        # ---- exact NCHW store: drop the 2 padded columns per row here in VMEM, so the wrapper
        #      does NOT need an extra output-sized HBM reshape+slice pass ----
        for hp in range(Hp):
            o_ref[b, :, hp, :] = acc[:, hp * Wpad:hp * Wpad + Wp].astype(o_ref.dtype)


def _pick_images_per_step(n, per_image_bytes, budget=1 << 20, max_images=8):
    """Largest divisor of n (<= max_images) whose blocks stay under ~1 MiB (amortize step overhead)."""
    best = 1
    for d in range(1, min(n, max_images) + 1):
        if n % d == 0 and d * per_image_bytes <= budget:
            best = d
    return best


def downsample(x_nchw, w_oihw, bias, *, scale_factor=2, use_bf16_mxu=False,
               images_per_step=None):
    """Forward of Downsample(in_ch, out_ch, scale_factor=2, pooling=True).

    x_nchw: (N, Cin, H, W) -> (N, Cout, H//2, W//2), PyTorch NCHW semantics.
    """
    # TODO(synk): the pooling=False branch of the module (stride-2 conv, no pool) is not implemented.
    N, Cin, H, W = x_nchw.shape
    Cout, Cin_w, KH, KW = w_oihw.shape
    assert scale_factor == 2 and H % 2 == 0 and W % 2 == 0
    assert (Cin_w, KH, KW) == (Cin, 3, 3)
    Hp, Wp = H // 2, W // 2
    Wpad = Wp + 2                 # conv left/right zero-pad columns kept in the flat spatial layout
    Hpad = Hp + 3                 # top pad row + bottom pad row + 1 overread-guard band
    L = Hp * Wpad
    mxu_dt = jnp.bfloat16 if use_bf16_mxu else jnp.float32

    # free, contiguous collapse: input rows (2hp, 2hp+1) become the two lane-halves of row c*Hp+hp.
    x_r = x_nchw.reshape(N, Cin * Hp, 2 * W)

    # layout-only parameter glue
    w2 = jnp.transpose(w_oihw, (0, 2, 3, 1)).reshape(Cout, 9 * Cin).astype(mxu_dt)  # K = (kh, kw, c)
    b2 = bias.reshape(Cout, 1).astype(jnp.float32)
    # 0.25 column-pair selector with the conv's zero-pad columns built in (cols 0 and Wpad-1 are 0).
    s = (0.25 * (jnp.arange(W)[:, None] // 2 == jnp.arange(Wpad)[None, :] - 1)).astype(mxu_dt)

    itm = x_nchw.dtype.itemsize
    if images_per_step is None:
        per_img = Cin * H * W * itm + Cout * Hp * Wp * itm
        images_per_step = _pick_images_per_step(N, per_img)
    Bn = images_per_step
    assert N % Bn == 0, "images_per_step must divide the batch size"

    kernel = functools.partial(_downsample_kernel, Bn=Bn, Cin=Cin, Cout=Cout,
                               Hp=Hp, Wp=Wp, W=W, Wpad=Wpad)

    # real VMEM need: double-buffered in/out blocks + resident params + scratch + main live values.
    mitm = jnp.dtype(mxu_dt).itemsize
    need = (2 * Bn * Cin * H * W * itm                         # input blocks (double-buffered)
            + 2 * Bn * Cout * Hp * Wp * itm                    # output blocks (double-buffered)
            + (W * Wpad + Cout * 9 * Cin) * mitm + Cout * 4    # s, w2, bias (grid-invariant)
            + Cin * Hpad * Wpad * mitm                         # flat padded pooled image scratch
            + (Cin * Hp * Wpad + Cout * L + Cin * Hp * 2 * W) * 4)  # pooled / acc / rows live values
    try:
        vmem_cap = int(pltpu.get_tpu_info().vmem_capacity_bytes)   # 128 MiB v5e/v6e, 64 MiB v7x
    except Exception:
        vmem_cap = 64 * 2 ** 20
    vmem_limit = int(min(0.85 * vmem_cap, max(32 * 2 ** 20, 2 * need)))
    # TODO(synk): if `need` exceeds ~0.85*VMEM (v7x with large Cin*H*W), add a halo-aware spatial
    # grid axis over Hp row-blocks instead of whole images per step.

    out = pl.pallas_call(
        kernel,
        out_shape=jax.ShapeDtypeStruct((N, Cout, Hp, Wp), x_nchw.dtype),
        grid_spec=pltpu.PrefetchScalarGridSpec(
            num_scalar_prefetch=0,
            grid=(N // Bn,),
            in_specs=[
                pl.BlockSpec((Bn, Cin * Hp, 2 * W), lambda n: (n, 0, 0)),
                pl.BlockSpec((W, Wpad), lambda n: (0, 0)),
                pl.BlockSpec((Cout, 9 * Cin), lambda n: (0, 0)),
                pl.BlockSpec((Cout, 1), lambda n: (0, 0)),
            ],
            out_specs=pl.BlockSpec((Bn, Cout, Hp, Wp), lambda n: (n, 0, 0, 0)),
            scratch_shapes=[pltpu.VMEM((Cin, Hpad * Wpad), mxu_dt)],
        ),
        compiler_params=pltpu.CompilerParams(
            dimension_semantics=("parallel",),
            vmem_limit_bytes=vmem_limit,
        ),
    )(x_r, s, w2, b2)
    return out   # already exact NCHW, no wrapper post-processing pass


if __name__ == "__main__":
    key = jax.random.PRNGKey(0)
    k1, k2, k3 = jax.random.split(key, 3)

    N, Cin, H, W = 2, 4, 16, 16
    Cout = 8

    x = jax.random.normal(k1, (N, Cin, H, W), jnp.float32)
    # Conv2d(Cin, Cout, kernel_size=3, stride=1, padding=1) parameters
    w = jax.random.normal(k2, (Cout, Cin, 3, 3), jnp.float32) * 0.1
    b = jax.random.normal(k3, (Cout,), jnp.float32) * 0.1

    out = jax.block_until_ready(downsample(x, w, b))

    # reference: AvgPool2d(2,2) + Conv2d(3x3, stride 1, pad 1) in plain JAX (NCHW)
    pooled = jax.lax.reduce_window(x, 0.0, jax.lax.add,
                                   (1, 1, 2, 2), (1, 1, 2, 2), "VALID") / 4.0
    ref = jax.lax.conv_general_dilated(
        pooled, w, window_strides=(1, 1), padding=((1, 1), (1, 1)),
        dimension_numbers=("NCHW", "OIHW", "NCHW"))
    ref = ref + b[None, :, None, None]

    assert out.shape == (N, Cout, H // 2, W // 2)
    assert jnp.allclose(out, ref, atol=1e-4, rtol=1e-4)
    print("KERNEL_OK")
</pallas_src>

<mosaic_0001>
module attributes {stable_mosaic.version = 11 : i64} {
  func.func @_downsample_kernel(%arg0: i32, %arg1: memref<2x32x32xf32, #tpu.memory_space<vmem>>, %arg2: memref<16x10xf32, #tpu.memory_space<vmem>>, %arg3: memref<8x36xf32, #tpu.memory_space<vmem>>, %arg4: memref<8x1xf32, #tpu.memory_space<vmem>>, %arg5: memref<2x8x8x8xf32, #tpu.memory_space<vmem>>, %arg6: memref<4x110xf32, #tpu.memory_space<vmem>>) attributes {dimension_semantics = [#tpu.dimension_semantics<parallel>], iteration_bounds = array<i64: 1>, scalar_prefetch = 0 : i64, scratch_operands = 1 : i64, tpu.core_type = #tpu.core_type<tc>, window_params = [{transform_indices = @transform_0, window_bounds = array<i64: 2, 32, 32>}, {pipeline_mode = #tpu.pipeline_mode<synchronous>, transform_indices = @transform_1, window_bounds = array<i64: 16, 10>}, {pipeline_mode = #tpu.pipeline_mode<synchronous>, transform_indices = @transform_2, window_bounds = array<i64: 8, 36>}, {pipeline_mode = #tpu.pipeline_mode<synchronous>, transform_indices = @transform_3, window_bounds = array<i64: 8, 1>}, {transform_indices = @transform_4, window_bounds = array<i64: 2, 8, 8, 8>}]} {
    %cst = arith.constant 0.000000e+00 : f32
    %0 = vector.broadcast %cst : f32 to vector<4x10xf32>
    %c0 = arith.constant 0 : index
    %c0_0 = arith.constant 0 : index
    %1 = vector.load %arg6[%c0, %c0_0] : memref<4x110xf32, #tpu.memory_space<vmem>>, vector<4x10xf32>
    tpu.vector_store %arg6[%c0, %c0_0], %0 {strides = array<i32>} : memref<4x110xf32, #tpu.memory_space<vmem>>, vector<4x10xf32>,
    %cst_1 = arith.constant 0.000000e+00 : f32
    %2 = vector.broadcast %cst_1 : f32 to vector<4x20xf32>
    %c0_2 = arith.constant 0 : index
    %c90 = arith.constant 90 : index
    %3 = vector.load %arg6[%c0_2, %c90] : memref<4x110xf32, #tpu.memory_space<vmem>>, vector<4x20xf32>
    tpu.vector_store %arg6[%c0_2, %c90], %2 {strides = array<i32>} : memref<4x110xf32, #tpu.memory_space<vmem>>, vector<4x20xf32>,
    %c0_3 = arith.constant 0 : index
    %c0_4 = arith.constant 0 : index
    %c0_5 = arith.constant 0 : index
    %4 = vector.load %arg1[%c0_3, %c0_4, %c0_5] : memref<2x32x32xf32, #tpu.memory_space<vmem>>, vector<1x32x32xf32>
    %5 = vector.shape_cast %4 : vector<1x32x32xf32> to vector<32x32xf32>
    %6 = vector.extract_strided_slice %5 {offsets = [0, 0], sizes = [32, 16], strides = [1, 1]} : vector<32x32xf32> to vector<32x16xf32>
    %7 = vector.extract_strided_slice %5 {offsets = [0, 16], sizes = [32, 16], strides = [1, 1]} : vector<32x32xf32> to vector<32x16xf32>
    %8 = arith.addf %6, %7 : vector<32x16xf32>
    %c0_6 = arith.constant 0 : index
    %c0_7 = arith.constant 0 : index
    %9 = vector.load %arg2[%c0_6, %c0_7] : memref<16x10xf32, #tpu.memory_space<vmem>>, vector<16x10xf32>
    %cst_8 = arith.constant dense<0.000000e+00> : vector<32x10xf32>
    %10 = tpu.matmul %8, %9, %cst_8 {dimension_numbers = #tpu.dot_dimension_numbers<[1], [0], [0], [1], [0, 0, 1, 1], [], []>} : vector<32x16xf32>, vector<16x10xf32>, vector<32x10xf32> -> vector<32x10xf32>
    %11 = vector.shape_cast %10 : vector<32x10xf32> to vector<4x8x10xf32>
    %12 = vector.extract_strided_slice %11 {offsets = [0, 0, 0], sizes = [4, 1, 10], strides = [1, 1, 1]} : vector<4x8x10xf32> to vector<4x1x10xf32>
    %13 = vector.shape_cast %12 : vector<4x1x10xf32> to vector<4x10xf32>
    %c0_9 = arith.constant 0 : index
    %c10 = arith.constant 10 : index
    %14 = vector.load %arg6[%c0_9, %c10] : memref<4x110xf32, #tpu.memory_space<vmem>>, vector<4x10xf32>
    tpu.vector_store %arg6[%c0_9, %c10], %13 {strides = array<i32>} : memref<4x110xf32, #tpu.memory_space<vmem>>, vector<4x10xf32>,
    %15 = vector.extract_strided_slice %11 {offsets = [0, 1, 0], sizes = [4, 1, 10], strides = [1, 1, 1]} : vector<4x8x10xf32> to vector<4x1x10xf32>
    %16 = vector.shape_cast %15 : vector<4x1x10xf32> to vector<4x10xf32>
    %c0_10 = arith.constant 0 : index
    %c20 = arith.constant 20 : index
    %17 = vector.load %arg6[%c0_10, %c20] : memref<4x110xf32, #tpu.memory_space<vmem>>, vector<4x10xf32>
    tpu.vector_store %arg6[%c0_10, %c20], %16 {strides = array<i32>} : memref<4x110xf32, #tpu.memory_space<vmem>>, vector<4x10xf32>,
    %18 = vector.extract_strided_slice %11 {offsets = [0, 2, 0], sizes = [4, 1, 10], strides = [1, 1, 1]} : vector<4x8x10xf32> to vector<4x1x10xf32>
    %19 = vector.shape_cast %18 : vector<4x1x10xf32> to vector<4x10xf32>
    %c0_11 = arith.constant 0 : index
    %c30 = arith.constant 30 : index
    %20 = vector.load %arg6[%c0_11, %c30] : memref<4x110xf32, #tpu.memory_space<vmem>>, vector<4x10xf32>
    tpu.vector_store %arg6[%c0_11, %c30], %19 {strides = array<i32>} : memref<4x110xf32, #tpu.memory_space<vmem>>, vector<4x10xf32>,
    %21 = vector.extract_strided_slice %11 {offsets = [0, 3, 0], sizes = [4, 1, 10], strides = [1, 1, 1]} : vector<4x8x10xf32> to vector<4x1x10xf32>
    %22 = vector.shape_cast %21 : vector<4x1x10xf32> to vector<4x10xf32>
    %c0_12 = arith.constant 0 : index
    %c40 = arith.constant 40 : index
    %23 = vector.load %arg6[%c0_12, %c40] : memref<4x110xf32, #tpu.memory_space<vmem>>, vector<4x10xf32>
    tpu.vector_store %arg6[%c0_12, %c40], %22 {strides = array<i32>} : memref<4x110xf32, #tpu.memory_space<vmem>>, vector<4x10xf32>,
    %24 = vector.extract_strided_slice %11 {offsets = [0, 4, 0], sizes = [4, 1, 10], strides = [1, 1, 1]} : vector<4x8x10xf32> to vector<4x1x10xf32>
    %25 = vector.shape_cast %24 : vector<4x1x10xf32> to vector<4x10xf32>
    %c0_13 = arith.constant 0 : index
    %c50 = arith.constant 50 : index
    %26 = vector.load %arg6[%c0_13, %c50] : memref<4x110xf32, #tpu.memory_space<vmem>>, vector<4x10xf32>
    tpu.vector_store %arg6[%c0_13, %c50], %25 {strides = array<i32>} : memref<4x110xf32, #tpu.memory_space<vmem>>, vector<4x10xf32>,
    %27 = vector.extract_strided_slice %11 {offsets = [0, 5, 0], sizes = [4, 1, 10], strides = [1, 1, 1]} : vector<4x8x10xf32> to vector<4x1x10xf32>
    %28 = vector.shape_cast %27 : vector<4x1x10xf32> to vector<4x10xf32>
    %c0_14 = arith.constant 0 : index
    %c60 = arith.constant 60 : index
    %29 = vector.load %arg6[%c0_14, %c60] : memref<4x110xf32, #tpu.memory_space<vmem>>, vector<4x10xf32>
    tpu.vector_store %arg6[%c0_14, %c60], %28 {strides = array<i32>} : memref<4x110xf32, #tpu.memory_space<vmem>>, vector<4x10xf32>,
    %30 = vector.extract_strided_slice %11 {offsets = [0, 6, 0], sizes = [4, 1, 10], strides = [1, 1, 1]} : vector<4x8x10xf32> to vector<4x1x10xf32>
    %31 = vector.shape_cast %30 : vector<4x1x10xf32> to vector<4x10xf32>
    %c0_15 = arith.constant 0 : index
    %c70 = arith.constant 70 : index
    %32 = vector.load %arg6[%c0_15, %c70] : memref<4x110xf32, #tpu.memory_space<vmem>>, vector<4x10xf32>
    tpu.vector_store %arg6[%c0_15, %c70], %31 {strides = array<i32>} : memref<4x110xf32, #tpu.memory_space<vmem>>, vector<4x10xf32>,
    %33 = vector.extract_strided_slice %11 {offsets = [0, 7, 0], sizes = [4, 1, 10], strides = [1, 1, 1]} : vector<4x8x10xf32> to vector<4x1x10xf32>
    %34 = vector.shape_cast %33 : vector<4x1x10xf32> to vector<4x10xf32>
    %c0_16 = arith.constant 0 : index
    %c80 = arith.constant 80 : index
    %35 = vector.load %arg6[%c0_16, %c80] : memref<4x110xf32, #tpu.memory_space<vmem>>, vector<4x10xf32>
    tpu.vector_store %arg6[%c0_16, %c80], %34 {strides = array<i32>} : memref<4x110xf32, #tpu.memory_space<vmem>>, vector<4x10xf32>,
    %c0_17 = arith.constant 0 : index
    %c0_18 = arith.constant 0 : index
    %36 = vector.load %arg3[%c0_17, %c0_18] : memref<8x36xf32, #tpu.memory_space<vmem>>, vector<8x4xf32>
    %c0_19 = arith.constant 0 : index
    %c0_20 = arith.constant 0 : index
    %37 = vector.load %arg6[%c0_19, %c0_20] : memref<4x110xf32, #tpu.memory_space<vmem>>, vector<4x80xf32>
    %cst_21 = arith.constant dense<0.000000e+00> : vector<8x80xf32>
    %38 = tpu.matmul %36, %37, %cst_21 {dimension_numbers = #tpu.dot_dimension_numbers<[1], [0], [0], [1], [0, 0, 1, 1], [], []>} : vector<8x4xf32>, vector<4x80xf32>, vector<8x80xf32> -> vector<8x80xf32>
    %c0_22 = arith.constant 0 : index
    %c4 = arith.constant 4 : index
    %39 = vector.load %arg3[%c0_22, %c4] : memref<8x36xf32, #tpu.memory_space<vmem>>, vector<8x4xf32>
    %c0_23 = arith.constant 0 : index
    %c1 = arith.constant 1 : index
    %40 = vector.load %arg6[%c0_23, %c1] : memref<4x110xf32, #tpu.memory_space<vmem>>, vector<4x80xf32>
    %cst_24 = arith.constant dense<0.000000e+00> : vector<8x80xf32>
    %41 = tpu.matmul %39, %40, %cst_24 {dimension_numbers = #tpu.dot_dimension_numbers<[1], [0], [0], [1], [0, 0, 1, 1], [], []>} : vector<8x4xf32>, vector<4x80xf32>, vector<8x80xf32> -> vector<8x80xf32>
    %42 = arith.addf %38, %41 : vector<8x80xf32>
    %c0_25 = arith.constant 0 : index
    %c8 = arith.constant 8 : index
    %43 = vector.load %arg3[%c0_25, %c8] : memref<8x36xf32, #tpu.memory_space<vmem>>, vector<8x4xf32>
    %c0_26 = arith.constant 0 : index
    %c2 = arith.constant 2 : index
    %44 = vector.load %arg6[%c0_26, %c2] : memref<4x110xf32, #tpu.memory_space<vmem>>, vector<4x80xf32>
    %cst_27 = arith.constant dense<0.000000e+00> : vector<8x80xf32>
    %45 = tpu.matmul %43, %44, %cst_27 {dimension_numbers = #tpu.dot_dimension_numbers<[1], [0], [0], [1], [0, 0, 1, 1], [], []>} : vector<8x4xf32>, vector<4x80xf32>, vector<8x80xf32> -> vector<8x80xf32>
    %46 = arith.addf %42, %45 : vector<8x80xf32>
    %c0_28 = arith.constant 0 : index
    %c12 = arith.constant 12 : index
    %47 = vector.load %arg3[%c0_28, %c12] : memref<8x36xf32, #tpu.memory_space<vmem>>, vector<8x4xf32>
    %c0_29 = arith.constant 0 : index
    %c10_30 = arith.constant 10 : index
    %48 = vector.load %arg6[%c0_29, %c10_30] : memref<4x110xf32, #tpu.memory_space<vmem>>, vector<4x80xf32>
    %cst_31 = arith.constant dense<0.000000e+00> : vector<8x80xf32>
    %49 = tpu.matmul %47, %48, %cst_31 {dimension_numbers = #tpu.dot_dimension_numbers<[1], [0], [0], [1], [0, 0, 1, 1], [], []>} : vector<8x4xf32>, vector<4x80xf32>, vector<8x80xf32> -> vector<8x80xf32>
    %50 = arith.addf %46, %49 : vector<8x80xf32>
    %c0_32 = arith.constant 0 : index
    %c16 = arith.constant 16 : index
    %51 = vector.load %arg3[%c0_32, %c16] : memref<8x36xf32, #tpu.memory_space<vmem>>, vector<8x4xf32>
    %c0_33 = arith.constant 0 : index
    %c11 = arith.constant 11 : index
    %52 = vector.load %arg6[%c0_33, %c11] : memref<4x110xf32, #tpu.memory_space<vmem>>, vector<4x80xf32>
    %cst_34 = arith.constant dense<0.000000e+00> : vector<8x80xf32>
    %53 = tpu.matmul %51, %52, %cst_34 {dimension_numbers = #tpu.dot_dimension_numbers<[1], [0], [0], [1], [0, 0, 1, 1], [], []>} : vector<8x4xf32>, vector<4x80xf32>, vector<8x80xf32> -> vector<8x80xf32>
    %54 = arith.addf %50, %53 : vector<8x80xf32>
    %c0_35 = arith.constant 0 : index
    %c20_36 = arith.constant 20 : index
    %55 = vector.load %arg3[%c0_35, %c20_36] : memref<8x36xf32, #tpu.memory_space<vmem>>, vector<8x4xf32>
    %c0_37 = arith.constant 0 : index
    %c12_38 = arith.constant 12 : index
    %56 = vector.load %arg6[%c0_37, %c12_38] : memref<4x110xf32, #tpu.memory_space<vmem>>, vector<4x80xf32>
    %cst_39 = arith.constant dense<0.000000e+00> : vector<8x80xf32>
    %57 = tpu.matmul %55, %56, %cst_39 {dimension_numbers = #tpu.dot_dimension_numbers<[1], [0], [0], [1], [0, 0, 1, 1], [], []>} : vector<8x4xf32>, vector<4x80xf32>, vector<8x80xf32> -> vector<8x80xf32>
    %58 = arith.addf %54, %57 : vector<8x80xf32>
    %c0_40 = arith.constant 0 : index
    %c24 = arith.constant 24 : index
    %59 = vector.load %arg3[%c0_40, %c24] : memref<8x36xf32, #tpu.memory_space<vmem>>, vector<8x4xf32>
    %c0_41 = arith.constant 0 : index
    %c20_42 = arith.constant 20 : index
    %60 = vector.load %arg6[%c0_41, %c20_42] : memref<4x110xf32, #tpu.memory_space<vmem>>, vector<4x80xf32>
    %cst_43 = arith.constant dense<0.000000e+00> : vector<8x80xf32>
    %61 = tpu.matmul %59, %60, %cst_43 {dimension_numbers = #tpu.dot_dimension_numbers<[1], [0], [0], [1], [0, 0, 1, 1], [], []>} : vector<8x4xf32>, vector<4x80xf32>, vector<8x80xf32> -> vector<8x80xf32>
    %62 = arith.addf %58, %61 : vector<8x80xf32>
    %c0_44 = arith.constant 0 : index
    %c28 = arith.constant 28 : index
    %63 = vector.load %arg3[%c0_44, %c28] : memref<8x36xf32, #tpu.memory_space<vmem>>, vector<8x4xf32>
    %c0_45 = arith.constant 0 : index
    %c21 = arith.constant 21 : index
    %64 = vector.load %arg6[%c0_45, %c21] : memref<4x110xf32, #tpu.memory_space<vmem>>, vector<4x80xf32>
    %cst_46 = arith.constant dense<0.000000e+00> : vector<8x80xf32>
    %65 = tpu.matmul %63, %64, %cst_46 {dimension_numbers = #tpu.dot_dimension_numbers<[1], [0], [0], [1], [0, 0, 1, 1], [], []>} : vector<8x4xf32>, vector<4x80xf32>, vector<8x80xf32> -> vector<8x80xf32>
    %66 = arith.addf %62, %65 : vector<8x80xf32>
    %c0_47 = arith.constant 0 : index
    %c32 = arith.constant 32 : index
    %67 = vector.load %arg3[%c0_47, %c32] : memref<8x36xf32, #tpu.memory_space<vmem>>, vector<8x4xf32>
    %c0_48 = arith.constant 0 : index
    %c22 = arith.constant 22 : index
    %68 = vector.load %arg6[%c0_48, %c22] : memref<4x110xf32, #tpu.memory_space<vmem>>, vector<4x80xf32>
    %cst_49 = arith.constant dense<0.000000e+00> : vector<8x80xf32>
    %69 = tpu.matmul %67, %68, %cst_49 {dimension_numbers = #tpu.dot_dimension_numbers<[1], [0], [0], [1], [0, 0, 1, 1], [], []>} : vector<8x4xf32>, vector<4x80xf32>, vector<8x80xf32> -> vector<8x80xf32>
    %70 = arith.addf %66, %69 : vector<8x80xf32>
    %c0_50 = arith.constant 0 : index
    %c0_51 = arith.constant 0 : index
    %71 = vector.load %arg4[%c0_50, %c0_51] : memref<8x1xf32, #tpu.memory_space<vmem>>, vector<8x1xf32>
    %72 = vector.broadcast %71 : vector<8x1xf32> to vector<8x80xf32>
    %73 = arith.addf %70, %72 : vector<8x80xf32>
    %74 = vector.extract_strided_slice %73 {offsets = [0, 0], sizes = [8, 8], strides = [1, 1]} : vector<8x80xf32> to vector<8x8xf32>
    %c0_52 = arith.constant 0 : index
    %c0_53 = arith.constant 0 : index
    %c0_54 = arith.constant 0 : index
    %c0_55 = arith.constant 0 : index
    %75 = vector.load %arg5[%c0_52, %c0_53, %c0_54, %c0_55] : memref<2x8x8x8xf32, #tpu.memory_space<vmem>>, vector<1x8x1x8xf32>
    %76 = vector.shape_cast %75 : vector<1x8x1x8xf32> to vector<8x8xf32>
    %77 = vector.shape_cast %74 : vector<8x8xf32> to vector<1x8x1x8xf32>
    tpu.vector_store %arg5[%c0_52, %c0_53, %c0_54, %c0_55], %77 {strides = array<i32>} : memref<2x8x8x8xf32, #tpu.memory_space<vmem>>, vector<1x8x1x8xf32>,
    %78 = vector.extract_strided_slice %73 {offsets = [0, 10], sizes = [8, 8], strides = [1, 1]} : vector<8x80xf32> to vector<8x8xf32>
    %c0_56 = arith.constant 0 : index
    %c0_57 = arith.constant 0 : index
    %c1_58 = arith.constant 1 : index
    %c0_59 = arith.constant 0 : index
    %79 = vector.load %arg5[%c0_56, %c0_57, %c1_58, %c0_59] : memref<2x8x8x8xf32, #tpu.memory_space<vmem>>, vector<1x8x1x8xf32>
    %80 = vector.shape_cast %79 : vector<1x8x1x8xf32> to vector<8x8xf32>
    %81 = vector.shape_cast %78 : vector<8x8xf32> to vector<1x8x1x8xf32>
    tpu.vector_store %arg5[%c0_56, %c0_57, %c1_58, %c0_59], %81 {strides = array<i32>} : memref<2x8x8x8xf32, #tpu.memory_space<vmem>>, vector<1x8x1x8xf32>,
    %82 = vector.extract_strided_slice %73 {offsets = [0, 20], sizes = [8, 8], strides = [1, 1]} : vector<8x80xf32> to vector<8x8xf32>
    %c0_60 = arith.constant 0 : index
    %c0_61 = arith.constant 0 : index
    %c2_62 = arith.constant 2 : index
    %c0_63 = arith.constant 0 : index
    %83 = vector.load %arg5[%c0_60, %c0_61, %c2_62, %c0_63] : memref<2x8x8x8xf32, #tpu.memory_space<vmem>>, vector<1x8x1x8xf32>
    %84 = vector.shape_cast %83 : vector<1x8x1x8xf32> to vector<8x8xf32>
    %85 = vector.shape_cast %82 : vector<8x8xf32> to vector<1x8x1x8xf32>
    tpu.vector_store %arg5[%c0_60, %c0_61, %c2_62, %c0_63], %85 {strides = array<i32>} : memref<2x8x8x8xf32, #tpu.memory_space<vmem>>, vector<1x8x1x8xf32>,
    %86 = vector.extract_strided_slice %73 {offsets = [0, 30], sizes = [8, 8], strides = [1, 1]} : vector<8x80xf32> to vector<8x8xf32>
    %c0_64 = arith.constant 0 : index
    %c0_65 = arith.constant 0 : index
    %c3 = arith.constant 3 : index
    %c0_66 = arith.constant 0 : index
    %87 = vector.load %arg5[%c0_64, %c0_65, %c3, %c0_66] : memref<2x8x8x8xf32, #tpu.memory_space<vmem>>, vector<1x8x1x8xf32>
    %88 = vector.shape_cast %87 : vector<1x8x1x8xf32> to vector<8x8xf32>
    %89 = vector.shape_cast %86 : vector<8x8xf32> to vector<1x8x1x8xf32>
    tpu.vector_store %arg5[%c0_64, %c0_65, %c3, %c0_66], %89 {strides = array<i32>} : memref<2x8x8x8xf32, #tpu.memory_space<vmem>>, vector<1x8x1x8xf32>,
    %90 = vector.extract_strided_slice %73 {offsets = [0, 40], sizes = [8, 8], strides = [1, 1]} : vector<8x80xf32> to vector<8x8xf32>
    %c0_67 = arith.constant 0 : index
    %c0_68 = arith.constant 0 : index
    %c4_69 = arith.constant 4 : index
    %c0_70 = arith.constant 0 : index
    %91 = vector.load %arg5[%c0_67, %c0_68, %c4_69, %c0_70] : memref<2x8x8x8xf32, #tpu.memory_space<vmem>>, vector<1x8x1x8xf32>
    %92 = vector.shape_cast %91 : vector<1x8x1x8xf32> to vector<8x8xf32>
    %93 = vector.shape_cast %90 : vector<8x8xf32> to vector<1x8x1x8xf32>
    tpu.vector_store %arg5[%c0_67, %c0_68, %c4_69, %c0_70], %93 {strides = array<i32>} : memref<2x8x8x8xf32, #tpu.memory_space<vmem>>, vector<1x8x1x8xf32>,
    %94 = vector.extract_strided_slice %73 {offsets = [0, 50], sizes = [8, 8], strides = [1, 1]} : vector<8x80xf32> to vector<8x8xf32>
    %c0_71 = arith.constant 0 : index
    %c0_72 = arith.constant 0 : index
    %c5 = arith.constant 5 : index
    %c0_73 = arith.constant 0 : index
    %95 = vector.load %arg5[%c0_71, %c0_72, %c5, %c0_73] : memref<2x8x8x8xf32, #tpu.memory_space<vmem>>, vector<1x8x1x8xf32>
    %96 = vector.shape_cast %95 : vector<1x8x1x8xf32> to vector<8x8xf32>
    %97 = vector.shape_cast %94 : vector<8x8xf32> to vector<1x8x1x8xf32>
    tpu.vector_store %arg5[%c0_71, %c0_72, %c5, %c0_73], %97 {strides = array<i32>} : memref<2x8x8x8xf32, #tpu.memory_space<vmem>>, vector<1x8x1x8xf32>,
    %98 = vector.extract_strided_slice %73 {offsets = [0, 60], sizes = [8, 8], strides = [1, 1]} : vector<8x80xf32> to vector<8x8xf32>
    %c0_74 = arith.constant 0 : index
    %c0_75 = arith.constant 0 : index
    %c6 = arith.constant 6 : index
    %c0_76 = arith.constant 0 : index
    %99 = vector.load %arg5[%c0_74, %c0_75, %c6, %c0_76] : memref<2x8x8x8xf32, #tpu.memory_space<vmem>>, vector<1x8x1x8xf32>
    %100 = vector.shape_cast %99 : vector<1x8x1x8xf32> to vector<8x8xf32>
    %101 = vector.shape_cast %98 : vector<8x8xf32> to vector<1x8x1x8xf32>
    tpu.vector_store %arg5[%c0_74, %c0_75, %c6, %c0_76], %101 {strides = array<i32>} : memref<2x8x8x8xf32, #tpu.memory_space<vmem>>, vector<1x8x1x8xf32>,
    %102 = vector.extract_strided_slice %73 {offsets = [0, 70], sizes = [8, 8], strides = [1, 1]} : vector<8x80xf32> to vector<8x8xf32>
    %c0_77 = arith.constant 0 : index
    %c0_78 = arith.constant 0 : index
    %c7 = arith.constant 7 : index
    %c0_79 = arith.constant 0 : index
    %103 = vector.load %arg5[%c0_77, %c0_78, %c7, %c0_79] : memref<2x8x8x8xf32, #tpu.memory_space<vmem>>, vector<1x8x1x8xf32>
    %104 = vector.shape_cast %103 : vector<1x8x1x8xf32> to vector<8x8xf32>
    %105 = vector.shape_cast %102 : vector<8x8xf32> to vector<1x8x1x8xf32>
    tpu.vector_store %arg5[%c0_77, %c0_78, %c7, %c0_79], %105 {strides = array<i32>} : memref<2x8x8x8xf32, #tpu.memory_space<vmem>>, vector<1x8x1x8xf32>,
    %c1_80 = arith.constant 1 : index
    %c0_81 = arith.constant 0 : index
    %c0_82 = arith.constant 0 : index
    %106 = vector.load %arg1[%c1_80, %c0_81, %c0_82] : memref<2x32x32xf32, #tpu.memory_space<vmem>>, vector<1x32x32xf32>
    %107 = vector.shape_cast %106 : vector<1x32x32xf32> to vector<32x32xf32>
    %108 = vector.extract_strided_slice %107 {offsets = [0, 0], sizes = [32, 16], strides = [1, 1]} : vector<32x32xf32> to vector<32x16xf32>
    %109 = vector.extract_strided_slice %107 {offsets = [0, 16], sizes = [32, 16], strides = [1, 1]} : vector<32x32xf32> to vector<32x16xf32>
    %110 = arith.addf %108, %109 : vector<32x16xf32>
    %c0_83 = arith.constant 0 : index
    %c0_84 = arith.constant 0 : index
    %111 = vector.load %arg2[%c0_83, %c0_84] : memref<16x10xf32, #tpu.memory_space<vmem>>, vector<16x10xf32>
    %cst_85 = arith.constant dense<0.000000e+00> : vector<32x10xf32>
    %112 = tpu.matmul %110, %111, %cst_85 {dimension_numbers = #tpu.dot_dimension_numbers<[1], [0], [0], [1], [0, 0, 1, 1], [], []>} : vector<32x16xf32>, vector<16x10xf32>, vector<32x10xf32> -> vector<32x10xf32>
    %113 = vector.shape_cast %112 : vector<32x10xf32> to vector<4x8x10xf32>
    %114 = vector.extract_strided_slice %113 {offsets = [0, 0, 0], sizes = [4, 1, 10], strides = [1, 1, 1]} : vector<4x8x10xf32> to vector<4x1x10xf32>
    %115 = vector.shape_cast %114 : vector<4x1x10xf32> to vector<4x10xf32>
    %c0_86 = arith.constant 0 : index
    %c10_87 = arith.constant 10 : index
    %116 = vector.load %arg6[%c0_86, %c10_87] : memref<4x110xf32, #tpu.memory_space<vmem>>, vector<4x10xf32>
    tpu.vector_store %arg6[%c0_86, %c10_87], %115 {strides = array<i32>} : memref<4x110xf32, #tpu.memory_space<vmem>>, vector<4x10xf32>,
    %117 = vector.extract_strided_slice %113 {offsets = [0, 1, 0], sizes = [4, 1, 10], strides = [1, 1, 1]} : vector<4x8x10xf32> to vector<4x1x10xf32>
    %118 = vector.shape_cast %117 : vector<4x1x10xf32> to vector<4x10xf32>
    %c0_88 = arith.constant 0 : index
    %c20_89 = arith.constant 20 : index
    %119 = vector.load %arg6[%c0_88, %c20_89] : memref<4x110xf32, #tpu.memory_space<vmem>>, vector<4x10xf32>
    tpu.vector_store %arg6[%c0_88, %c20_89], %118 {strides = array<i32>} : memref<4x110xf32, #tpu.memory_space<vmem>>, vector<4x10xf32>,
    %120 = vector.extract_strided_slice %113 {offsets = [0, 2, 0], sizes = [4, 1, 10], strides = [1, 1, 1]} : vector<4x8x10xf32> to vector<4x1x10xf32>
    %121 = vector.shape_cast %120 : vector<4x1x10xf32> to vector<4x10xf32>
    %c0_90 = arith.constant 0 : index
    %c30_91 = arith.constant 30 : index
    %122 = vector.load %arg6[%c0_90, %c30_91] : memref<4x110xf32, #tpu.memory_space<vmem>>, vector<4x10xf32>
    tpu.vector_store %arg6[%c0_90, %c30_91], %121 {strides = array<i32>} : memref<4x110xf32, #tpu.memory_space<vmem>>, vector<4x10xf32>,
    %123 = vector.extract_strided_slice %113 {offsets = [0, 3, 0], sizes = [4, 1, 10], strides = [1, 1, 1]} : vector<4x8x10xf32> to vector<4x1x10xf32>
    %124 = vector.shape_cast %123 : vector<4x1x10xf32> to vector<4x10xf32>
    %c0_92 = arith.constant 0 : index
    %c40_93 = arith.constant 40 : index
    %125 = vector.load %arg6[%c0_92, %c40_93] : memref<4x110xf32, #tpu.memory_space<vmem>>, vector<4x10xf32>
    tpu.vector_store %arg6[%c0_92, %c40_93], %124 {strides = array<i32>} : memref<4x110xf32, #tpu.memory_space<vmem>>, vector<4x10xf32>,
    %126 = vector.extract_strided_slice %113 {offsets = [0, 4, 0], sizes = [4, 1, 10], strides = [1, 1, 1]} : vector<4x8x10xf32> to vector<4x1x10xf32>
    %127 = vector.shape_cast %126 : vector<4x1x10xf32> to vector<4x10xf32>
    %c0_94 = arith.constant 0 : index
    %c50_95 = arith.constant 50 : index
    %128 = vector.load %arg6[%c0_94, %c50_95] : memref<4x110xf32, #tpu.memory_space<vmem>>, vector<4x10xf32>
    tpu.vector_store %arg6[%c0_94, %c50_95], %127 {strides = array<i32>} : memref<4x110xf32, #tpu.memory_space<vmem>>, vector<4x10xf32>,
    %129 = vector.extract_strided_slice %113 {offsets = [0, 5, 0], sizes = [4, 1, 10], strides = [1, 1, 1]} : vector<4x8x10xf32> to vector<4x1x10xf32>
    %130 = vector.shape_cast %129 : vector<4x1x10xf32> to vector<4x10xf32>
    %c0_96 = arith.constant 0 : index
    %c60_97 = arith.constant 60 : index
    %131 = vector.load %arg6[%c0_96, %c60_97] : memref<4x110xf32, #tpu.memory_space<vmem>>, vector<4x10xf32>
    tpu.vector_store %arg6[%c0_96, %c60_97], %130 {strides = array<i32>} : memref<4x110xf32, #tpu.memory_space<vmem>>, vector<4x10xf32>,
    %132 = vector.extract_strided_slice %113 {offsets = [0, 6, 0], sizes = [4, 1, 10], strides = [1, 1, 1]} : vector<4x8x10xf32> to vector<4x1x10xf32>
    %133 = vector.shape_cast %132 : vector<4x1x10xf32> to vector<4x10xf32>
    %c0_98 = arith.constant 0 : index
    %c70_99 = arith.constant 70 : index
    %134 = vector.load %arg6[%c0_98, %c70_99] : memref<4x110xf32, #tpu.memory_space<vmem>>, vector<4x10xf32>
    tpu.vector_store %arg6[%c0_98, %c70_99], %133 {strides = array<i32>} : memref<4x110xf32, #tpu.memory_space<vmem>>, vector<4x10xf32>,
    %135 = vector.extract_strided_slice %113 {offsets = [0, 7, 0], sizes = [4, 1, 10], strides = [1, 1, 1]} : vector<4x8x10xf32> to vector<4x1x10xf32>
    %136 = vector.shape_cast %135 : vector<4x1x10xf32> to vector<4x10xf32>
    %c0_100 = arith.constant 0 : index
    %c80_101 = arith.constant 80 : index
    %137 = vector.load %arg6[%c0_100, %c80_101] : memref<4x110xf32, #tpu.memory_space<vmem>>, vector<4x10xf32>
    tpu.vector_store %arg6[%c0_100, %c80_101], %136 {strides = array<i32>} : memref<4x110xf32, #tpu.memory_space<vmem>>, vector<4x10xf32>,
    %c0_102 = arith.constant 0 : index
    %c0_103 = arith.constant 0 : index
    %138 = vector.load %arg3[%c0_102, %c0_103] : memref<8x36xf32, #tpu.memory_space<vmem>>, vector<8x4xf32>
    %c0_104 = arith.constant 0 : index
    %c0_105 = arith.constant 0 : index
    %139 = vector.load %arg6[%c0_104, %c0_105] : memref<4x110xf32, #tpu.memory_space<vmem>>, vector<4x80xf32>
    %cst_106 = arith.constant dense<0.000000e+00> : vector<8x80xf32>
    %140 = tpu.matmul %138, %139, %cst_106 {dimension_numbers = #tpu.dot_dimension_numbers<[1], [0], [0], [1], [0, 0, 1, 1], [], []>} : vector<8x4xf32>, vector<4x80xf32>, vector<8x80xf32> -> vector<8x80xf32>
    %c0_107 = arith.constant 0 : index
    %c4_108 = arith.constant 4 : index
    %141 = vector.load %arg3[%c0_107, %c4_108] : memref<8x36xf32, #tpu.memory_space<vmem>>, vector<8x4xf32>
    %c0_109 = arith.constant 0 : index
    %c1_110 = arith.constant 1 : index
    %142 = vector.load %arg6[%c0_109, %c1_110] : memref<4x110xf32, #tpu.memory_space<vmem>>, vector<4x80xf32>
    %cst_111 = arith.constant dense<0.000000e+00> : vector<8x80xf32>
    %143 = tpu.matmul %141, %142, %cst_111 {dimension_numbers = #tpu.dot_dimension_numbers<[1], [0], [0], [1], [0, 0, 1, 1], [], []>} : vector<8x4xf32>, vector<4x80xf32>, vector<8x80xf32> -> vector<8x80xf32>
    %144 = arith.addf %140, %143 : vector<8x80xf32>
    %c0_112 = arith.constant 0 : index
    %c8_113 = arith.constant 8 : index
    %145 = vector.load %arg3[%c0_112, %c8_113] : memref<8x36xf32, #tpu.memory_space<vmem>>, vector<8x4xf32>
    %c0_114 = arith.constant 0 : index
    %c2_115 = arith.constant 2 : index
    %146 = vector.load %arg6[%c0_114, %c2_115] : memref<4x110xf32, #tpu.memory_space<vmem>>, vector<4x80xf32>
    %cst_116 = arith.constant dense<0.000000e+00> : vector<8x80xf32>
    %147 = tpu.matmul %145, %146, %cst_116 {dimension_numbers = #tpu.dot_dimension_numbers<[1], [0], [0], [1], [0, 0, 1, 1], [], []>} : vector<8x4xf32>, vector<4x80xf32>, vector<8x80xf32> -> vector<8x80xf32>
    %148 = arith.addf %144, %147 : vector<8x80xf32>
    %c0_117 = arith.constant 0 : index
    %c12_118 = arith.constant 12 : index
    %149 = vector.load %arg3[%c0_117, %c12_118] : memref<8x36xf32, #tpu.memory_space<vmem>>, vector<8x4xf32>
    %c0_119 = arith.constant 0 : index
    %c10_120 = arith.constant 10 : index
    %150 = vector.load %arg6[%c0_119, %c10_120] : memref<4x110xf32, #tpu.memory_space<vmem>>, vector<4x80xf32>
    %cst_121 = arith.constant dense<0.000000e+00> : vector<8x80xf32>
    %151 = tpu.matmul %149, %150, %cst_121 {dimension_numbers = #tpu.dot_dimension_numbers<[1], [0], [0], [1], [0, 0, 1, 1], [], []>} : vector<8x4xf32>, vector<4x80xf32>, vector<8x80xf32> -> vector<8x80xf32>
    %152 = arith.addf %148, %151 : vector<8x80xf32>
    %c0_122 = arith.constant 0 : index
    %c16_123 = arith.constant 16 : index
    %153 = vector.load %arg3[%c0_122, %c16_123] : memref<8x36xf32, #tpu.memory_space<vmem>>, vector<8x4xf32>
    %c0_124 = arith.constant 0 : index
    %c11_125 = arith.constant 11 : index
    %154 = vector.load %arg6[%c0_124, %c11_125] : memref<4x110xf32, #tpu.memory_space<vmem>>, vector<4x80xf32>
    %cst_126 = arith.constant dense<0.000000e+00> : vector<8x80xf32>
    %155 = tpu.matmul %153, %154, %cst_126 {dimension_numbers = #tpu.dot_dimension_numbers<[1], [0], [0], [1], [0, 0, 1, 1], [], []>} : vector<8x4xf32>, vector<4x80xf32>, vector<8x80xf32> -> vector<8x80xf32>
    %156 = arith.addf %152, %155 : vector<8x80xf32>
    %c0_127 = arith.constant 0 : index
    %c20_128 = arith.constant 20 : index
    %157 = vector.load %arg3[%c0_127, %c20_128] : memref<8x36xf32, #tpu.memory_space<vmem>>, vector<8x4xf32>
    %c0_129 = arith.constant 0 : index
    %c12_130 = arith.constant 12 : index
    %158 = vector.load %arg6[%c0_129, %c12_130] : memref<4x110xf32, #tpu.memory_space<vmem>>, vector<4x80xf32>
    %cst_131 = arith.constant dense<0.000000e+00> : vector<8x80xf32>
    %159 = tpu.matmul %157, %158, %cst_131 {dimension_numbers = #tpu.dot_dimension_numbers<[1], [0], [0], [1], [0, 0, 1, 1], [], []>} : vector<8x4xf32>, vector<4x80xf32>, vector<8x80xf32> -> vector<8x80xf32>
    %160 = arith.addf %156, %159 : vector<8x80xf32>
    %c0_132 = arith.constant 0 : index
    %c24_133 = arith.constant 24 : index
    %161 = vector.load %arg3[%c0_132, %c24_133] : memref<8x36xf32, #tpu.memory_space<vmem>>, vector<8x4xf32>
    %c0_134 = arith.constant 0 : index
    %c20_135 = arith.constant 20 : index
    %162 = vector.load %arg6[%c0_134, %c20_135] : memref<4x110xf32, #tpu.memory_space<vmem>>, vector<4x80xf32>
    %cst_136 = arith.constant dense<0.000000e+00> : vector<8x80xf32>
    %163 = tpu.matmul %161, %162, %cst_136 {dimension_numbers = #tpu.dot_dimension_numbers<[1], [0], [0], [1], [0, 0, 1, 1], [], []>} : vector<8x4xf32>, vector<4x80xf32>, vector<8x80xf32> -> vector<8x80xf32>
    %164 = arith.addf %160, %163 : vector<8x80xf32>
    %c0_137 = arith.constant 0 : index
    %c28_138 = arith.constant 28 : index
    %165 = vector.load %arg3[%c0_137, %c28_138] : memref<8x36xf32, #tpu.memory_space<vmem>>, vector<8x4xf32>
    %c0_139 = arith.constant 0 : index
    %c21_140 = arith.constant 21 : index
    %166 = vector.load %arg6[%c0_139, %c21_140] : memref<4x110xf32, #tpu.memory_space<vmem>>, vector<4x80xf32>
    %cst_141 = arith.constant dense<0.000000e+00> : vector<8x80xf32>
    %167 = tpu.matmul %165, %166, %cst_141 {dimension_numbers = #tpu.dot_dimension_numbers<[1], [0], [0], [1], [0, 0, 1, 1], [], []>} : vector<8x4xf32>, vector<4x80xf32>, vector<8x80xf32> -> vector<8x80xf32>
    %168 = arith.addf %164, %167 : vector<8x80xf32>
    %c0_142 = arith.constant 0 : index
    %c32_143 = arith.constant 32 : index
    %169 = vector.load %arg3[%c0_142, %c32_143] : memref<8x36xf32, #tpu.memory_space<vmem>>, vector<8x4xf32>
    %c0_144 = arith.constant 0 : index
    %c22_145 = arith.constant 22 : index
    %170 = vector.load %arg6[%c0_144, %c22_145] : memref<4x110xf32, #tpu.memory_space<vmem>>, vector<4x80xf32>
    %cst_146 = arith.constant dense<0.000000e+00> : vector<8x80xf32>
    %171 = tpu.matmul %169, %170, %cst_146 {dimension_numbers = #tpu.dot_dimension_numbers<[1], [0], [0], [1], [0, 0, 1, 1], [], []>} : vector<8x4xf32>, vector<4x80xf32>, vector<8x80xf32> -> vector<8x80xf32>
    %172 = arith.addf %168, %171 : vector<8x80xf32>
    %c0_147 = arith.constant 0 : index
    %c0_148 = arith.constant 0 : index
    %173 = vector.load %arg4[%c0_147, %c0_148] : memref<8x1xf32, #tpu.memory_space<vmem>>, vector<8x1xf32>
    %174 = vector.broadcast %173 : vector<8x1xf32> to vector<8x80xf32>
    %175 = arith.addf %172, %174 : vector<8x80xf32>
    %176 = vector.extract_strided_slice %175 {offsets = [0, 0], sizes = [8, 8], strides = [1, 1]} : vector<8x80xf32> to vector<8x8xf32>
    %c1_149 = arith.constant 1 : index
    %c0_150 = arith.constant 0 : index
    %c0_151 = arith.constant 0 : index
    %c0_152 = arith.constant 0 : index
    %177 = vector.load %arg5[%c1_149, %c0_150, %c0_151, %c0_152] : memref<2x8x8x8xf32, #tpu.memory_space<vmem>>, vector<1x8x1x8xf32>
    %178 = vector.shape_cast %177 : vector<1x8x1x8xf32> to vector<8x8xf32>
    %179 = vector.shape_cast %176 : vector<8x8xf32> to vector<1x8x1x8xf32>
    tpu.vector_store %arg5[%c1_149, %c0_150, %c0_151, %c0_152], %179 {strides = array<i32>} : memref<2x8x8x8xf32, #tpu.memory_space<vmem>>, vector<1x8x1x8xf32>,
    %180 = vector.extract_strided_slice %175 {offsets = [0, 10], sizes = [8, 8], strides = [1, 1]} : vector<8x80xf32> to vector<8x8xf32>
    %c1_153 = arith.constant 1 : index
    %c0_154 = arith.constant 0 : index
    %c1_155 = arith.constant 1 : index
    %c0_156 = arith.constant 0 : index
    %181 = vector.load %arg5[%c1_153, %c0_154, %c1_155, %c0_156] : memref<2x8x8x8xf32, #tpu.memory_space<vmem>>, vector<1x8x1x8xf32>
    %182 = vector.shape_cast %181 : vector<1x8x1x8xf32> to vector<8x8xf32>
    %183 = vector.shape_cast %180 : vector<8x8xf32> to vector<1x8x1x8xf32>
    tpu.vector_store %arg5[%c1_153, %c0_154, %c1_155, %c0_156], %183 {strides = array<i32>} : memref<2x8x8x8xf32, #tpu.memory_space<vmem>>, vector<1x8x1x8xf32>,
    %184 = vector.extract_strided_slice %175 {offsets = [0, 20], sizes = [8, 8], strides = [1, 1]} : vector<8x80xf32> to vector<8x8xf32>
    %c1_157 = arith.constant 1 : index
    %c0_158 = arith.constant 0 : index
    %c2_159 = arith.constant 2 : index
    %c0_160 = arith.constant 0 : index
    %185 = vector.load %arg5[%c1_157, %c0_158, %c2_159, %c0_160] : memref<2x8x8x8xf32, #tpu.memory_space<vmem>>, vector<1x8x1x8xf32>
    %186 = vector.shape_cast %185 : vector<1x8x1x8xf32> to vector<8x8xf32>
    %187 = vector.shape_cast %184 : vector<8x8xf32> to vector<1x8x1x8xf32>
    tpu.vector_store %arg5[%c1_157, %c0_158, %c2_159, %c0_160], %187 {strides = array<i32>} : memref<2x8x8x8xf32, #tpu.memory_space<vmem>>, vector<1x8x1x8xf32>,
    %188 = vector.extract_strided_slice %175 {offsets = [0, 30], sizes = [8, 8], strides = [1, 1]} : vector<8x80xf32> to vector<8x8xf32>
    %c1_161 = arith.constant 1 : index
    %c0_162 = arith.constant 0 : index
    %c3_163 = arith.constant 3 : index
    %c0_164 = arith.constant 0 : index
    %189 = vector.load %arg5[%c1_161, %c0_162, %c3_163, %c0_164] : memref<2x8x8x8xf32, #tpu.memory_space<vmem>>, vector<1x8x1x8xf32>
    %190 = vector.shape_cast %189 : vector<1x8x1x8xf32> to vector<8x8xf32>
    %191 = vector.shape_cast %188 : vector<8x8xf32> to vector<1x8x1x8xf32>
    tpu.vector_store %arg5[%c1_161, %c0_162, %c3_163, %c0_164], %191 {strides = array<i32>} : memref<2x8x8x8xf32, #tpu.memory_space<vmem>>, vector<1x8x1x8xf32>,
    %192 = vector.extract_strided_slice %175 {offsets = [0, 40], sizes = [8, 8], strides = [1, 1]} : vector<8x80xf32> to vector<8x8xf32>
    %c1_165 = arith.constant 1 : index
    %c0_166 = arith.constant 0 : index
    %c4_167 = arith.constant 4 : index
    %c0_168 = arith.constant 0 : index
    %193 = vector.load %arg5[%c1_165, %c0_166, %c4_167, %c0_168] : memref<2x8x8x8xf32, #tpu.memory_space<vmem>>, vector<1x8x1x8xf32>
    %194 = vector.shape_cast %193 : vector<1x8x1x8xf32> to vector<8x8xf32>
    %195 = vector.shape_cast %192 : vector<8x8xf32> to vector<1x8x1x8xf32>
    tpu.vector_store %arg5[%c1_165, %c0_166, %c4_167, %c0_168], %195 {strides = array<i32>} : memref<2x8x8x8xf32, #tpu.memory_space<vmem>>, vector<1x8x1x8xf32>,
    %196 = vector.extract_strided_slice %175 {offsets = [0, 50], sizes = [8, 8], strides = [1, 1]} : vector<8x80xf32> to vector<8x8xf32>
    %c1_169 = arith.constant 1 : index
    %c0_170 = arith.constant 0 : index
    %c5_171 = arith.constant 5 : index
    %c0_172 = arith.constant 0 : index
    %197 = vector.load %arg5[%c1_169, %c0_170, %c5_171, %c0_172] : memref<2x8x8x8xf32, #tpu.memory_space<vmem>>, vector<1x8x1x8xf32>
    %198 = vector.shape_cast %197 : vector<1x8x1x8xf32> to vector<8x8xf32>
    %199 = vector.shape_cast %196 : vector<8x8xf32> to vector<1x8x1x8xf32>
    tpu.vector_store %arg5[%c1_169, %c0_170, %c5_171, %c0_172], %199 {strides = array<i32>} : memref<2x8x8x8xf32, #tpu.memory_space<vmem>>, vector<1x8x1x8xf32>,
    %200 = vector.extract_strided_slice %175 {offsets = [0, 60], sizes = [8, 8], strides = [1, 1]} : vector<8x80xf32> to vector<8x8xf32>
    %c1_173 = arith.constant 1 : index
    %c0_174 = arith.constant 0 : index
    %c6_175 = arith.constant 6 : index
    %c0_176 = arith.constant 0 : index
    %201 = vector.load %arg5[%c1_173, %c0_174, %c6_175, %c0_176] : memref<2x8x8x8xf32, #tpu.memory_space<vmem>>, vector<1x8x1x8xf32>
    %202 = vector.shape_cast %201 : vector<1x8x1x8xf32> to vector<8x8xf32>
    %203 = vector.shape_cast %200 : vector<8x8xf32> to vector<1x8x1x8xf32>
    tpu.vector_store %arg5[%c1_173, %c0_174, %c6_175, %c0_176], %203 {strides = array<i32>} : memref<2x8x8x8xf32, #tpu.memory_space<vmem>>, vector<1x8x1x8xf32>,
    %204 = vector.extract_strided_slice %175 {offsets = [0, 70], sizes = [8, 8], strides = [1, 1]} : vector<8x80xf32> to vector<8x8xf32>
    %c1_177 = arith.constant 1 : index
    %c0_178 = arith.constant 0 : index
    %c7_179 = arith.constant 7 : index
    %c0_180 = arith.constant 0 : index
    %205 = vector.load %arg5[%c1_177, %c0_178, %c7_179, %c0_180] : memref<2x8x8x8xf32, #tpu.memory_space<vmem>>, vector<1x8x1x8xf32>
    %206 = vector.shape_cast %205 : vector<1x8x1x8xf32> to vector<8x8xf32>
    %207 = vector.shape_cast %204 : vector<8x8xf32> to vector<1x8x1x8xf32>
    tpu.vector_store %arg5[%c1_177, %c0_178, %c7_179, %c0_180], %207 {strides = array<i32>} : memref<2x8x8x8xf32, #tpu.memory_space<vmem>>, vector<1x8x1x8xf32>,
    return
  }
  func.func @transform_0(%arg0: i32) -> (i32, i32, i32) {
    %c0_i32 = arith.constant 0 : i32
    %c0_i32_0 = arith.constant 0 : i32
    %c0_i32_1 = arith.constant 0 : i32
    return %arg0, %c0_i32, %c0_i32_0 : i32, i32, i32
  }
  func.func @transform_1(%arg0: i32) -> (i32, i32) {
    %c0_i32 = arith.constant 0 : i32
    %c0_i32_0 = arith.constant 0 : i32
    %c0_i32_1 = arith.constant 0 : i32
    return %c0_i32, %c0_i32_0 : i32, i32
  }
  func.func @transform_2(%arg0: i32) -> (i32, i32) {
    %c0_i32 = arith.constant 0 : i32
    %c0_i32_0 = arith.constant 0 : i32
    %c0_i32_1 = arith.constant 0 : i32
    return %c0_i32, %c0_i32_0 : i32, i32
  }
  func.func @transform_3(%arg0: i32) -> (i32, i32) {
    %c0_i32 = arith.constant 0 : i32
    %c0_i32_0 = arith.constant 0 : i32
    %c0_i32_1 = arith.constant 0 : i32
    return %c0_i32, %c0_i32_0 : i32, i32
  }
  func.func @transform_4(%arg0: i32) -> (i32, i32, i32, i32) {
    %c0_i32 = arith.constant 0 : i32
    %c0_i32_0 = arith.constant 0 : i32
    %c0_i32_1 = arith.constant 0 : i32
    %c0_i32_2 = arith.constant 0 : i32
    return %arg0, %c0_i32, %c0_i32_0, %c0_i32_1 : i32, i32, i32, i32
  }
}

</mosaic_0001>

<bundles_post_ra>
// kernel: tpu_custom_call.1
= control target key start
LH: loop header
LB: loop body
LE: loop exit
PB: predicated region body
PF: predicated region fallthrough
CT: control target
= control target key end

     0   :  { %9 = vsyncpa [#allocation4], 0  ;;  %s3617_s0 = inlined_call_operand.hbm [shape: f32[2,32,32], index: 0, kind: input, shape index: {}]   ;;  %s3618_s1 = inlined_call_operand.hbm [shape: f32[16,10], index: 1, kind: input, shape index: {}]   ;;  %s3619_s2 = inlined_call_operand.vmem [shape: f32[8,36], index: 2, kind: input, shape index: {}]   ;;  %s3620_s3 = inlined_call_operand.vmem [shape: f32[8,1], index: 3, kind: input, shape index: {}]   ;;  %s3621_s4 = inlined_call_operand.hbm [shape: f32[2,8,8,8], index: 4, kind: output, shape index: {}]  }
   0x1   :  { %10 = vsyncpa [#allocation7], 0 }
   0x2   :  { %11 = vsyncpa [#allocation5], 0  ;;  %s2878_s15 = smov [#allocation3]   ;;  %s2806_s19 = scalar_lea.hbm %s3617_s0, 1024 }
   0x3   :  { %s17_s16 = sshll.u32 %s2878_s15, 4  ;;  %p2807_p0 = scmp.ne.s32.totalorder %s3617_s0, %s2806_s19  ;;  %s18_s16 = int_to_ptr.vmem [resolvable:$true] %s17_s16 }
   0x4   :  { %p2810_p1 = scmp.lt.u32.totalorder %s2806_s19, %s3617_s0 }
   0x6   :  { %p2812_p2 = pnand %p2810_p1, %p2807_p0 }
   0x8   :  { %2815 = shalt.err (!%p2812_p2)
}
   0x9   :  { %s2816_s24 = scalar_lea.vmem %s18_s16, 1024  ;;  %p2821_p4 = scmp.lt.s32.totalorder %s18_s16, %s18_s16 }
   0xa   :  { %p2817_p3 = scmp.ne.s32.totalorder %s18_s16, %s2816_s24  ;;  %p2822_p5 = scmp.lt.s32.totalorder %s2816_s24, %s2816_s24 }
   0xc   :  { %p2823_p6 = por %p2822_p5, %p2821_p4 }
   0xe   :  { %p2824_p7 = pnand %p2823_p6, %p2817_p3 }
  0x10   :  { %2827 = shalt.err (!%p2824_p7)
}
  0x11   :  { %s2879_s25 = smov 128   ;;  %s2880_s26 = smov 8  }
  0x12   :  { %23 = dma.hbm_to_vmem [thread:$0]  %s3617_s0, 1024, %s18_s16, [#allocation4], %s2879_s25, %s2879_s25, %s2880_s26  }
  0x13   :  { %s2881_s29 = smov [#allocation6]   ;;  %s2828_s7 = scalar_lea.hbm %s3618_s1, 256 }
  0x14   :  { %s29_s30 = sshll.u32 %s2881_s29, 4  ;;  %p2829_p8 = scmp.ne.s32.totalorder %s3618_s1, %s2828_s7  ;;  %s30_s30 = int_to_ptr.vmem [resolvable:$true] %s29_s30 }
  0x15   :  { %p2832_p9 = scmp.lt.u32.totalorder %s2828_s7, %s3618_s1 }
  0x17   :  { %p2834_p10 = pnand %p2832_p9, %p2829_p8 }
  0x19   :  { %2837 = shalt.err (!%p2834_p10)
}
  0x1a   :  { %s2838_s12 = scalar_lea.vmem %s30_s30, 256  ;;  %p2843_p12 = scmp.lt.s32.totalorder %s30_s30, %s30_s30 }
  0x1b   :  { %p2839_p11 = scmp.ne.s32.totalorder %s30_s30, %s2838_s12  ;;  %p2844_p13 = scmp.lt.s32.totalorder %s2838_s12, %s2838_s12 }
  0x1d   :  { %p2845_p0 = por %p2844_p13, %p2843_p12 }
  0x1f   :  { %p2846_p1 = pnand %p2845_p0, %p2839_p11 }
  0x21   :  { %2849 = shalt.err (!%p2846_p1)
}
  0x22   :  { %35 = dma.hbm_to_vmem [thread:$0]  %s3618_s1, 256, %s30_s30, [#allocation7], %s2879_s25, %s2879_s25, %s2880_s26  }
  0x23   :  { %2872 = dma.done.wait [#allocation4], 1024  }
  0x24   :  { %2873 = vsyncadd [#allocation4], 4294966272 }
  0x25   :  { %2874 = dma.done.wait [#allocation7], 256  }
  0x26   :  { %2875 = vsyncadd [#allocation7], 4294967040  ;;  %v50_v0 = vld [vmem:[#allocation3] sm:$0xff]  ;;  %v52_v1 = vld [vmem:[#allocation3 + $0x10] sm:$0xff]  ;;  %s2882_s14 = smov 112   ;;  %vm76_vm0 = vcmask 130048  }
  0x27   :  { %58 = vrot.lane.b32.xlu0 %v50_v0, %s2882_s14  ;;  %62 = vrot.lane.b32.xlu1 %v52_v1, %s2882_s14  ;;  %v74_v2 = vld [vmem:[#allocation6] sm:$0xff]  ;;  %v75_v3 = vld [vmem:[#allocation6 + $0x8] sm:$0xff]  ;;  %v53_v5 = vld [vmem:[#allocation3 + $0x18] sm:$0xff]  ;;  %vm46_vm1 = vcmask 76800   ;;  %vm48_vm2 = vcmask 896720   ;;  %vm221_vm3 = vcmask 1047559  }
  0x28   :  { %v51_v4 = vld [vmem:[#allocation3 + $0x8] sm:$0xff]  ;;  %v2971_v6 = vpack.c.bf16 %v75_v3, %v74_v2  ;;  %vm212_vm4 = vcmask 1046534   ;;  %vm179_vm5 = vcmask 1041409   ;;  %vm182_vm6 = vcmask 1042434   ;;  %s2884_s1 = smov 70   ;;  %s2885_s15 = smov 60  }
  0x29   :  { %v2883_v16 = vmov 0.0   ;;  %vm3623_vm7 = vcmask 1043459   ;;  %vm194_vm8 = vcmask 1044484   ;;  %vm3622_vm9 = vcmask 1045509   ;;  %s2886_s16 = smov 20   ;;  %s2887_s17 = smov 10  }
  0x2a   :  { %2761 = vmatprep.subr.bf16.mxu0 %v2971_v6  ;;  %47 = vst.msk [vmem:[#allocation2] sm:$0xf] %vm46_vm1, %v2883_v16  ;;  %2660 = vmatprep.subr.mxu1 %v2883_v16  ;;  %s2888_s18 = smov 40   ;;  %s2889_s19 = smov 30   ;;  %v3020_v44 = vld [vmem:[%s3619_s2] sm:$0xff]  ;;  %v3028_v45 = vld [vmem:[#allocation3 + $0x28] sm:$0xff] }
  0x2b   :  { %60 = vrot.lane.b32.xlu0 %v51_v4, %s2882_s14  ;;  %64 = vrot.lane.b32.xlu1 %v53_v5, %s2882_s14  ;;  %49 = vst.msk [vmem:[#allocation2] sm:$0xf] %vm48_vm2, %v2883_v16  ;;  %s2890_s20 = smov 80   ;;  %s2891_s21 = smov 50   ;;  %v3032_v46 = vld [vmem:[#allocation3 + $0x38] sm:$0xff]  ;;  %vm3624_vm10 = vcmask 158800  }
  0x2c   :  { %2763 = vmatpush3.bf16.msra.mxu0 %v2971_v6  ;;  %s2892_s24 = smov 116   ;;  %s2893_s27 = smov 108   ;;  %vm199_vm11 = vcmask 241825   ;;  %vm208_vm12 = vcmask 324850   ;;  %vm3625_vm13 = vcmask 407875   ;;  %vm226_vm14 = vcmask 490900  }
  0x2d   :  { %2675 = vmatprep.subr.mxu0 %v2883_v16  ;;  %s2894_s28 = smov 100   ;;  %vm236_vm15 = vcmask 572901   ;;  %vm238_vm1 = vcmask 565728   ;;  %vm248_vm2 = vcmask 654902   ;;  %s2896_s2 = smov 118   ;;  %v1306_v59 = vld [vmem:[#allocation3 + $0x20] sm:$0xff] }
  0x2e   :  { %s2897_s29 = smov 107   ;;  %v1308_v60 = vld [vmem:[#allocation3 + $0x30] sm:$0xff]  ;;  %s2898_s30 = smov 127  }
  0x2f   :  { %s2899_s5 = smov 126   ;;  %s2900_s6 = smov 124  }
  0x30   :  { %s2901_s7 = smov 117   ;;  %s2902_s8 = smov 120  }
  0x31   :  { %s2903_s9 = smov 106   ;;  %s2904_s10 = smov 104  }
  0x32   :  { %s2905_s11 = smov 96   ;;  %s2909_s13 = smov 88  }
  0x99   :  { %v59_v7 = vpop.permute.xlu0 %58  ;;  %v63_v8 = vpop.permute.xlu1 %62 }
  0x9a   :  { %v70_v9 = vadd.f32 %v59_v7, %v50_v0  ;;  %v72_v10 = vadd.f32 %v63_v8, %v52_v1 }
  0x9c   :  { %2654 = vmatprep.mubr.msk.f32.mxu0 %vm76_vm0, %v70_v9 }
  0x9d   :  { %v61_v11 = vpop.permute.xlu0 %60  ;;  %v65_v12 = vpop.permute.xlu1 %64 }
  0x9e   :  { %v71_v13 = vadd.f32 %v61_v11, %v51_v4  ;;  %v73_v14 = vadd.f32 %v65_v12, %v53_v5 }
  0xa0   :  { %2655 = vmatmul.mubr.msk.f32.vlgmr.msra.gmra.mrb[0].mxu0 %vm76_vm0, %v71_v13 }
  0xa1   :  { %2657 = vmatprep.mubr.msk.f32.mxu0 %vm76_vm0, %v72_v10 }
  0xa4   :  { %2658 = vmatmul.mubr.msk.f32.gmra.mrb[2].mxu0 %vm76_vm0, %v73_v14 }
 0x173   :  { %v2656_v15 = vpop.f32.mrb[0].mxu0 }
 0x174   :  { %v178_v17 = vrot.slane %v2656_v15, 7  ;;  %v155_v18 = vpop.f32.mrb[1].mxu0 }
 0x176   :  { %v240_v19 = vsel %vm221_vm3, %v178_v17, %v155_v18  ;;  %v228_v20 = vsel %vm212_vm4, %v178_v17, %v155_v18  ;;  %v192_v21 = vsel %vm182_vm6, %v178_v17, %v155_v18  ;;  %v180_v22 = vsel %vm179_vm5, %v178_v17, %v155_v18 }
 0x177   :  { %242 = vrot.lane.b32.xlu1 %v240_v19, %s2884_s1  ;;  %v2659_v23 = vpop.f32.mrb[2].mxu0  ;;  %v210_v24 = vsel %vm194_vm8, %v178_v17, %v155_v18  ;;  %v201_v25 = vsel %vm3623_vm7, %v178_v17, %v155_v18  ;;  %v219_v26 = vsel %vm3622_vm9, %v178_v17, %v155_v18 }
 0x178   :  { %v184_v27 = vrot.slane %v2659_v23, 5  ;;  %v165_v28 = vpop.f32.mrb[3].mxu0 }
 0x179   :  { %v181_v29 = vrot.slane %v165_v28, 6 }
 0x17a   :  { %232 = vrot.lane.b32.xlu0 %v184_v27, %s2885_s15 }
 0x17b   :  { %v229_v30 = vsel %vm221_vm3, %v181_v29, %v228_v20  ;;  %v241_v31 = vsel %vm179_vm5, %v184_v27, %v181_v29  ;;  %v193_v32 = vsel %vm3623_vm7, %v181_v29, %v192_v21  ;;  %v183_v33 = vsel %vm182_vm6, %v181_v29, %v180_v22 }
 0x17c   :  { %230 = vrot.lane.b32.xlu1 %v229_v30, %s2885_s15  ;;  %v195_v34 = vsel %vm194_vm8, %v184_v27, %v193_v32  ;;  %v186_v35 = vsel %vm3623_vm7, %v184_v27, %v183_v33  ;;  %v211_v36 = vsel %vm3622_vm9, %v181_v29, %v210_v24  ;;  %v202_v37 = vsel %vm194_vm8, %v181_v29, %v201_v25 }
 0x17d   :  { %v213_v38 = vsel %vm212_vm4, %v184_v27, %v211_v36  ;;  %v204_v39 = vsel %vm3622_vm9, %v184_v27, %v202_v37  ;;  %v220_v40 = vsel %vm212_vm4, %v181_v29, %v219_v26  ;;  %v252_v41 = vsel %vm179_vm5, %v181_v29, %v178_v17 }
 0x17e   :  { %244 = vrot.lane.b32.xlu0 %v241_v31, %s2884_s1  ;;  %v222_v42 = vsel %vm221_vm3, %v184_v27, %v220_v40  ;;  %v253_v43 = vsel %vm182_vm6, %v184_v27, %v252_v41  ;;  %vm250_vm9 = vcmask 648752   ;;  %vm3627_vm7 = vcmask 736903  }
 0x180   :  { %196 = vrot.lane.b32.xlu1 %v195_v34, %s2886_s16 }
 0x182   :  { %187 = vrot.lane.b32.xlu0 %v186_v35, %s2887_s17 }
 0x184   :  { %214 = vrot.lane.b32.xlu1 %v213_v38, %s2888_s18 }
 0x186   :  { %205 = vrot.lane.b32.xlu0 %v204_v39, %s2889_s19 }
 0x188   :  { %254 = vrot.lane.b32.xlu1 %v155_v18, %s2890_s20 }
 0x18a   :  { %223 = vrot.lane.b32.xlu0 %v222_v42, %s2891_s21 }
 0x18e   :  { %256 = vrot.lane.b32.xlu0 %v253_v43, %s2890_s20 }
 0x192   :  { %501 = vrot.lane.b32.xlu0 %v3020_v44, %s2892_s24 }
 0x196   :  { %659 = vrot.lane.b32.xlu0 %v3020_v44, %s2893_s27 }
 0x19a   :  { %817 = vrot.lane.b32.xlu0 %v3020_v44, %s2894_s28 }
 0x19e   :  { %1316 = vrot.lane.b32.xlu0 %v3028_v45, %s2882_s14 }
 0x1a2   :  { %1320 = vrot.lane.b32.xlu0 %v3032_v46, %s2882_s14 }
 0x1e9   :  { %v243_v47 = vpop.permute.xlu1 %242 }
 0x1ec   :  { %v233_v48 = vpop.permute.xlu0 %232 }
 0x1ee   :  { %v231_v49 = vpop.permute.xlu1 %230 }
 0x1f0   :  { %v245_v50 = vpop.permute.xlu0 %244 }
 0x1f2   :  { %v197_v51 = vpop.permute.xlu1 %196 }
 0x1f4   :  { %v188_v52 = vpop.permute.xlu0 %187 }
 0x1f5   :  { %191 = vst.msk [vmem:[#allocation2] sm:$0xf] %vm3624_vm10, %v188_v52  ;;  %vm3628_vm10 = vmmov 0  }
 0x1f6   :  { %200 = vst.msk [vmem:[#allocation2 - $0x1] sm:$0x1e] %vm199_vm11, %v197_v51  ;;  %v215_v54 = vpop.permute.xlu1 %214  ;;  %2677 = vmatprep.mubr.msk.f32.mxu0 %vm3628_vm10, %v2883_v16  ;;  %2662 = vmatprep.mubr.msk.f32.mxu1 %vm3628_vm10, %v2883_v16 }
 0x1f8   :  { %v206_v53 = vpop.permute.xlu0 %205 }
 0x1f9   :  { %209 = vst.msk [vmem:[#allocation2 - $0x2] sm:$0x3c] %vm208_vm12, %v206_v53 }
 0x1fa   :  { %218 = vst.msk [vmem:[#allocation2 - $0x3] sm:$0x78] %vm3625_vm13, %v215_v54  ;;  %vm3626_vm13 = vcmask 731776   ;;  %v255_v56 = vpop.permute.xlu1 %254 }
 0x1fc   :  { %v224_v55 = vpop.permute.xlu0 %223 }
 0x1fd   :  { %227 = vst.msk [vmem:[#allocation2 - $0x4] sm:$0xf0] %vm226_vm14, %v224_v55 }
 0x1fe   :  { %237 = vst.msk [vmem:[#allocation2 - $0x5] sm:$0xe0] %vm236_vm15, %v231_v49 }
 0x1ff   :  { %239 = vst.msk [vmem:[#allocation2 + $0x3] sm:$0x1] %vm238_vm1, %v233_v48 }
 0x200   :  { %249 = vst.msk [vmem:[#allocation2 - $0x6] sm:$0xc0] %vm248_vm2, %v243_v47  ;;  %v257_v57 = vpop.permute.xlu0 %256  ;;  %v2906_v47 = vmov 0  }
 0x201   :  { %251 = vst.msk [vmem:[#allocation2 + $0x2] sm:$0x3] %vm250_vm9, %v245_v50  ;;  %2804 = vset.pattern.permute.xlu0 %v2906_v47  ;;  %2805 = vset.pattern.permute.xlu1 %v2906_v47 }
 0x202   :  { %261 = vst.msk [vmem:[#allocation2 - $0x7] sm:$0x80] %vm3627_vm7, %v255_v56  ;;  %vm3630_vm7 = vcmask 31744  }
 0x203   :  { %263 = vst.msk [vmem:[#allocation2 + $0x1] sm:$0x7] %vm3626_vm13, %v257_v57  ;;  %vm3631_vm13 = vcmask 1043456  }
 0x204   :  { %v502_v61 = vpop.permute.xlu0 %501 }
 0x208   :  { %v660_v62 = vpop.permute.xlu0 %659 }
 0x20a   :  { %v3051_v58 = vld [vmem:[#allocation2] sm:$0xf] }
 0x20b   :  { %503 = vrot.lane.b32.xlu1 %v3051_v58, %s2896_s2 }
 0x20c   :  { %v818_v0 = vpop.permute.xlu0 %817 }
 0x20f   :  { %661 = vrot.lane.b32.xlu1 %v3051_v58, %s2892_s24 }
 0x210   :  { %v1317_v2 = vpop.permute.xlu0 %1316 }
 0x211   :  { %v1327_v5 = vadd.f32 %v1317_v2, %v3028_v45 }
 0x213   :  { %819 = vrot.lane.b32.xlu1 %v3051_v58, %s2897_s29 }
 0x214   :  { %v1321_v8 = vpop.permute.xlu0 %1320 }
 0x215   :  { %v1329_v10 = vadd.f32 %v1321_v8, %v3032_v46 }
 0x217   :  { %1314 = vrot.lane.b32.xlu1 %v1306_v59, %s2882_s14 }
 0x21b   :  { %1318 = vrot.lane.b32.xlu1 %v1308_v60, %s2882_s14 }
 0x27d   :  { %v504_v63 = vpop.permute.xlu1 %503 }
 0x27e   :  { %2676 = vmatpush3.msk.msra.mxu0 %vm3631_vm13, %v504_v63 }
 0x27f   :  { %2678 = vmatmul.mubr.msk.f32.vlgmr.msra.gmra.mrb[4].mxu0 %vm3630_vm7, %v502_v61  ;;  %2685 = vmatprep.subr.mxu0 %v2883_v16 }
 0x280   :  { %2687 = vmatprep.mubr.msk.f32.mxu0 %vm3628_vm10, %v2883_v16 }
 0x281   :  { %v662_v1 = vpop.permute.xlu1 %661 }
 0x282   :  { %2686 = vmatpush3.msk.msra.mxu0 %vm3631_vm13, %v662_v1 }
 0x283   :  { %2688 = vmatmul.mubr.msk.f32.vlgmr.msra.gmra.mrb[6].mxu0 %vm3630_vm7, %v660_v62  ;;  %2695 = vmatprep.subr.mxu0 %v2883_v16 }
 0x284   :  { %2697 = vmatprep.mubr.msk.f32.mxu0 %vm3628_vm10, %v2883_v16 }
 0x285   :  { %v820_v3 = vpop.permute.xlu1 %819 }
 0x286   :  { %2696 = vmatpush3.msk.msra.mxu0 %vm3631_vm13, %v820_v3 }
 0x287   :  { %2698 = vmatmul.mubr.msk.f32.vlgmr.msra.gmra.mrb[8].mxu0 %vm3630_vm7, %v818_v0  ;;  %2765 = vmatprep.subr.bf16.mxu0 %v2971_v6 }
 0x288   :  { %2767 = vmatpush3.bf16.msra.mxu0 %v2971_v6 }
 0x289   :  { %v1315_v4 = vpop.permute.xlu1 %1314  ;;  %2725 = vmatprep.subr.mxu0 %v2883_v16 }
 0x28a   :  { %v1326_v7 = vadd.f32 %v1315_v4, %v1306_v59 }
 0x28c   :  { %2709 = vmatprep.mubr.msk.f32.mxu0 %vm76_vm0, %v1326_v7  ;;  %v3204_v7 = vld [vmem:[%s3620_s3] sm:$0xff]  ;;  %s2908_s3 = smov 98  }
 0x28d   :  { %2710 = vmatmul.mubr.msk.f32.vlgmr.msra.gmra.mrb[10].mxu0 %vm76_vm0, %v1327_v5  ;;  %v1319_v9 = vpop.permute.xlu1 %1318 }
 0x28e   :  { %v1328_v11 = vadd.f32 %v1319_v9, %v1308_v60 }
 0x290   :  { %2712 = vmatprep.mubr.msk.f32.mxu0 %vm76_vm0, %v1328_v11 }
 0x291   :  { %2713 = vmatmul.mubr.msk.f32.gmra.mrb[12].mxu0 %vm76_vm0, %v1329_v10  ;;  %vm3632_vm0 = vcmask 1043459  }
 0x292   :  { %2727 = vmatprep.mubr.msk.f32.mxu0 %vm3628_vm10, %v2883_v16  ;;  %vm3633_vm10 = vcmask 1045509   ;;  %vm3634_vm7 = vmmov %vm3632_vm0 }
 0x293   :  { %vm3635_vm13 = vmmov %vm3633_vm10 }
 0x352   :  { %v3084_v6 = vpop.f32.mrb[4].mxu0 }
 0x353   :  { %v2679_v12 = vpop.f32.mrb[5].mxu0 }
 0x356   :  { %v3086_v13 = vpop.f32.mrb[6].mxu0 }
 0x357   :  { %v2689_v14 = vpop.f32.mrb[7].mxu0 }
 0x35a   :  { %v3088_v15 = vpop.f32.mrb[8].mxu0 }
 0x35b   :  { %v2699_v17 = vpop.f32.mrb[9].mxu0 }
 0x360   :  { %v2711_v18 = vpop.f32.mrb[10].mxu0 }
 0x361   :  { %v1433_v19 = vrot.slane %v2711_v18, 7  ;;  %v1410_v20 = vpop.f32.mrb[11].mxu0 }
 0x363   :  { %v1481_v21 = vsel %vm221_vm3, %v1433_v19, %v1410_v20  ;;  %v1471_v22 = vsel %vm212_vm4, %v1433_v19, %v1410_v20  ;;  %v1443_v23 = vsel %vm182_vm6, %v1433_v19, %v1410_v20  ;;  %v1434_v24 = vsel %vm179_vm5, %v1433_v19, %v1410_v20 }
 0x364   :  { %v2714_v25 = vpop.f32.mrb[12].mxu0  ;;  %1483 = vrot.lane.b32.xlu0 %v1481_v21, %s2884_s1  ;;  %v1457_v26 = vsel %vm194_vm8, %v1433_v19, %v1410_v20  ;;  %v1450_v27 = vsel %vm3632_vm0, %v1433_v19, %v1410_v20  ;;  %v1464_v28 = vsel %vm3633_vm10, %v1433_v19, %v1410_v20 }
 0x365   :  { %v1437_v29 = vrot.slane %v2714_v25, 5  ;;  %v1420_v30 = vpop.f32.mrb[13].mxu0 }
 0x366   :  { %v1435_v31 = vrot.slane %v1420_v30, 6 }
 0x367   :  { %1475 = vrot.lane.b32.xlu1 %v1437_v29, %s2885_s15 }
 0x368   :  { %v1472_v32 = vsel %vm221_vm3, %v1435_v31, %v1471_v22  ;;  %v1482_v33 = vsel %vm179_vm5, %v1437_v29, %v1435_v31  ;;  %v1444_v34 = vsel %vm3634_vm7, %v1435_v31, %v1443_v23  ;;  %v1436_v35 = vsel %vm182_vm6, %v1435_v31, %v1434_v24 }
 0x369   :  { %1473 = vrot.lane.b32.xlu0 %v1472_v32, %s2885_s15  ;;  %v1445_v36 = vsel %vm194_vm8, %v1437_v29, %v1444_v34  ;;  %v1438_v37 = vsel %vm3632_vm0, %v1437_v29, %v1436_v35  ;;  %v1458_v38 = vsel %vm3633_vm10, %v1435_v31, %v1457_v26  ;;  %v1451_v39 = vsel %vm194_vm8, %v1435_v31, %v1450_v27  ;;  %s2912_s15 = smov 58  }
 0x36a   :  { %v1459_v40 = vsel %vm212_vm4, %v1437_v29, %v1458_v38  ;;  %v1452_v41 = vsel %vm3635_vm13, %v1437_v29, %v1451_v39  ;;  %v1465_v42 = vsel %vm212_vm4, %v1435_v31, %v1464_v28  ;;  %v1491_v43 = vsel %vm179_vm5, %v1435_v31, %v1433_v19 }
 0x36b   :  { %1485 = vrot.lane.b32.xlu1 %v1482_v33, %s2884_s1  ;;  %v1466_v45 = vsel %vm221_vm3, %v1437_v29, %v1465_v42  ;;  %v1492_v46 = vsel %vm182_vm6, %v1437_v29, %v1491_v43  ;;  %vm3636_vm3 = vcmask 158800   ;;  %vm3637_vm4 = vcmask 407875   ;;  %s2911_s1 = smov 68  }
 0x36c   :  { %vm3638_vm5 = vcmask 1043456   ;;  %vm3639_vm6 = vcmask 736903   ;;  %vm3640_vm7 = vcmask 731776   ;;  %vm3641_vm8 = vcmask 31744  }
 0x36d   :  { %1446 = vrot.lane.b32.xlu0 %v1445_v36, %s2886_s16  ;;  %vm3645_vm13 = vmmov %vm3638_vm5  ;;  %v987_v39 = vlaneseq  ;;  %s2913_s16 = smov [#allocation8]  }
 0x36f   :  { %1439 = vrot.lane.b32.xlu1 %v1438_v37, %s2887_s17  ;;  %v2907_v37 = vmov 1966171168   ;;  %s2545_s17 = sshll.u32 %s2913_s16, 4  ;;  %s2546_s17 = int_to_ptr.vmem [resolvable:$true] %s2545_s17 }
 0x370   :  { %v985_v38 = vunpack.c.l.s4 %v2907_v37  ;;  %p2855_p3 = scmp.lt.s32.totalorder %s2546_s17, %s2546_s17 }
 0x371   :  { %1460 = vrot.lane.b32.xlu0 %v1459_v40, %s2888_s18  ;;  %s2850_s18 = scalar_lea.vmem %s2546_s17, 2048 }
 0x372   :  { %p2851_p2 = scmp.ne.s32.totalorder %s2546_s17, %s2850_s18  ;;  %p2856_p4 = scmp.lt.s32.totalorder %s2850_s18, %s2850_s18 }
 0x373   :  { %1453 = vrot.lane.b32.xlu1 %v1452_v41, %s2889_s19 }
 0x374   :  { %p2857_p5 = por %p2856_p4, %p2855_p3 }
 0x375   :  { %1493 = vrot.lane.b32.xlu0 %v1410_v20, %s2890_s20 }
 0x376   :  { %p2858_p6 = pnand %p2857_p5, %p2851_p2 }
 0x377   :  { %1467 = vrot.lane.b32.xlu1 %v1466_v45, %s2891_s21  ;;  %v986_v45 = vunpack.c.0.s8 %v985_v38 }
 0x379   :  { %270 = vrot.lane.b32.xlu0 %v3051_v58, %s2898_s30 }
 0x37b   :  { %1495 = vrot.lane.b32.xlu1 %v1492_v46, %s2890_s20  ;;  %v988_v46 = vshrl.u32 %v987_v39, 7 }
 0x37d   :  { %424 = vrot.lane.b32.xlu0 %v3051_v58, %s2899_s5 }
 0x37f   :  { %267 = vrot.lane.b32.xlu1 %v3020_v44, %s2900_s6 }
 0x381   :  { %582 = vrot.lane.b32.xlu0 %v3051_v58, %s2901_s7 }
 0x383   :  { %422 = vrot.lane.b32.xlu1 %v3020_v44, %s2902_s8 }
 0x385   :  { %740 = vrot.lane.b32.xlu0 %v3051_v58, %s2893_s27 }
 0x387   :  { %580 = vrot.lane.b32.xlu1 %v3020_v44, %s2882_s14 }
 0x389   :  { %898 = vrot.lane.b32.xlu0 %v3051_v58, %s2903_s9 }
 0x38b   :  { %738 = vrot.lane.b32.xlu1 %v3020_v44, %s2904_s10 }
 0x38f   :  { %896 = vrot.lane.b32.xlu1 %v3020_v44, %s2905_s11 }
 0x393   :  { %1504 = vrot.lane.b32.xlu1 %v3020_v44, %s2900_s6 }
 0x397   :  { %1657 = vrot.lane.b32.xlu1 %v3020_v44, %s2902_s8 }
 0x39b   :  { %1736 = vrot.lane.b32.xlu1 %v3020_v44, %s2892_s24 }
 0x39f   :  { %1815 = vrot.lane.b32.xlu1 %v3020_v44, %s2882_s14  ;;  %s2910_s14 = smov 78  }
 0x3a3   :  { %1894 = vrot.lane.b32.xlu1 %v3020_v44, %s2893_s27 }
 0x3a7   :  { %1973 = vrot.lane.b32.xlu1 %v3020_v44, %s2904_s10 }
 0x3ab   :  { %2052 = vrot.lane.b32.xlu1 %v3020_v44, %s2894_s28 }
 0x3af   :  { %2131 = vrot.lane.b32.xlu1 %v3020_v44, %s2905_s11 }
 0x3d6   :  { %v1484_v48 = vpop.permute.xlu0 %1483 }
 0x3d9   :  { %v1476_v49 = vpop.permute.xlu1 %1475 }
 0x3db   :  { %v1474_v50 = vpop.permute.xlu0 %1473 }
 0x3dd   :  { %v1486_v51 = vpop.permute.xlu1 %1485 }
 0x3df   :  { %v1447_v52 = vpop.permute.xlu0 %1446 }
 0x3e1   :  { %v1440_v53 = vpop.permute.xlu1 %1439 }
 0x3e2   :  { %1442 = vst.msk [vmem:[#allocation2] sm:$0xf] %vm3636_vm3, %v1440_v53 }
 0x3e3   :  { %1449 = vst.msk [vmem:[#allocation2 - $0x1] sm:$0x1e] %vm199_vm11, %v1447_v52  ;;  %v1461_v54 = vpop.permute.xlu0 %1460  ;;  %vm3642_vm11 = vmmov %vm3638_vm5 }
 0x3e5   :  { %v1454_v55 = vpop.permute.xlu1 %1453 }
 0x3e6   :  { %1456 = vst.msk [vmem:[#allocation2 - $0x2] sm:$0x3c] %vm208_vm12, %v1454_v55  ;;  %vm3643_vm12 = vmmov 0   ;;  %v3253_v55 = vsub.s32 0, %v988_v46 }
 0x3e7   :  { %1463 = vst.msk [vmem:[#allocation2 - $0x3] sm:$0x78] %vm3637_vm4, %v1461_v54  ;;  %v1494_v56 = vpop.permute.xlu0 %1493 }
 0x3e9   :  { %v1468_v57 = vpop.permute.xlu1 %1467 }
 0x3ea   :  { %1470 = vst.msk [vmem:[#allocation2 - $0x4] sm:$0xf0] %vm226_vm14, %v1468_v57  ;;  %vm3646_vm14 = vmmov %vm3641_vm8 }
 0x3eb   :  { %1479 = vst.msk [vmem:[#allocation2 - $0x5] sm:$0xe0] %vm236_vm15, %v1474_v50  ;;  %v271_v59 = vpop.permute.xlu0 %270  ;;  %vm3647_vm15 = vmmov %vm3638_vm5 }
 0x3ec   :  { %1480 = vst.msk [vmem:[#allocation2 + $0x3] sm:$0x1] %vm238_vm1, %v1476_v49  ;;  %2661 = vmatpush3.msk.msra.mxu1 %vm3638_vm5, %v271_v59  ;;  %vm3648_vm1 = vmmov %vm3641_vm8 }
 0x3ed   :  { %1489 = vst.msk [vmem:[#allocation2 - $0x6] sm:$0xc0] %vm248_vm2, %v1484_v48  ;;  %v1496_v60 = vpop.permute.xlu1 %1495  ;;  %2665 = vmatprep.subr.mxu1 %v2883_v16  ;;  %vm3649_vm2 = vmmov %vm3638_vm5 }
 0x3ee   :  { %1490 = vst.msk [vmem:[#allocation2 + $0x2] sm:$0x3] %vm250_vm9, %v1486_v51  ;;  %vm3644_vm9 = vmmov %vm3641_vm8  ;;  %v3250_v51 = vsub.s32 %v986_v45, %v988_v46 }
 0x3ef   :  { %1499 = vst.msk [vmem:[#allocation2 - $0x7] sm:$0x80] %vm3639_vm6, %v1494_v56  ;;  %v425_v61 = vpop.permute.xlu0 %424  ;;  %vm3650_vm0 = vmmov %vm3648_vm1 }
 0x3f0   :  { %1500 = vst.msk [vmem:[#allocation2 + $0x1] sm:$0x7] %vm3640_vm7, %v1496_v60  ;;  %vm3651_vm10 = vmmov %vm3649_vm2 }
 0x3f1   :  { %v268_v62 = vpop.permute.xlu1 %267  ;;  %vm3652_vm3 = vmmov %vm3650_vm0 }
 0x3f2   :  { %2663 = vmatmul.mubr.msk.f32.vlgmr.msra.gmra.mrb[0].mxu1 %vm3641_vm8, %v268_v62  ;;  %vm3653_vm4 = vmmov %vm3649_vm2 }
 0x3f3   :  { %2666 = vmatpush3.msk.msra.mxu1 %vm3642_vm11, %v3051_v58  ;;  %2667 = vmatprep.mubr.msk.f32.mxu1 %vm3643_vm12, %v2883_v16  ;;  %v583_v1 = vpop.permute.xlu0 %582  ;;  %vm3654_vm5 = vmmov %vm3650_vm0 }
 0x3f4   :  { %2670 = vmatprep.subr.mxu1 %v2883_v16  ;;  %vm3655_vm6 = vmmov %vm3649_vm2 }
 0x3f5   :  { %v423_v0 = vpop.permute.xlu1 %422  ;;  %vm3656_vm7 = vmmov %vm3649_vm2 }
 0x3f6   :  { %2668 = vmatmul.mubr.msk.f32.vlgmr.msra.gmra.mrb[2].mxu1 %vm3644_vm9, %v3020_v44  ;;  %vm3657_vm8 = vmmov %vm3650_vm0 }
 0x3f7   :  { %v1502_v63 = vld [vmem:[#allocation2] sm:$0xf]  ;;  %2671 = vmatpush3.msk.msra.mxu1 %vm3645_vm13, %v425_v61  ;;  %2672 = vmatprep.mubr.msk.f32.mxu1 %vm3643_vm12, %v2883_v16  ;;  %v741_v2 = vpop.permute.xlu0 %740  ;;  %vm3658_vm11 = vmmov %vm3650_vm0 }
 0x3f8   :  { %1507 = vrot.lane.b32.xlu0 %v1502_v63, %s2898_s30  ;;  %2680 = vmatprep.subr.mxu1 %v2883_v16  ;;  %vm3659_vm9 = vmmov %vm3649_vm2 }
 0x3f9   :  { %v581_v58 = vpop.permute.xlu1 %580  ;;  %vm3660_vm13 = vmmov %vm3650_vm0 }
 0x3fa   :  { %2673 = vmatmul.mubr.msk.f32.vlgmr.msra.gmra.mrb[4].mxu1 %vm3646_vm14, %v423_v0  ;;  %vm3661_vm14 = vmmov %vm3649_vm2 }
 0x3fb   :  { %2681 = vmatpush3.msk.msra.mxu1 %vm3647_vm15, %v583_v1  ;;  %2682 = vmatprep.mubr.msk.f32.mxu1 %vm3643_vm12, %v2883_v16  ;;  %v899_v4 = vpop.permute.xlu0 %898  ;;  %vm3662_vm15 = vmmov %vm3650_vm0 }
 0x3fc   :  { %1659 = vrot.lane.b32.xlu0 %v1502_v63, %s2899_s5  ;;  %2690 = vmatprep.subr.mxu1 %v2883_v16 }
 0x3fd   :  { %v739_v3 = vpop.permute.xlu1 %738 }
 0x3fe   :  { %2683 = vmatmul.mubr.msk.f32.vlgmr.msra.gmra.mrb[6].mxu1 %vm3648_vm1, %v581_v58  ;;  %vm3663_vm1 = vmmov %vm3649_vm2 }
 0x3ff   :  { %2691 = vmatpush3.msk.msra.mxu1 %vm3649_vm2, %v741_v2  ;;  %2692 = vmatprep.mubr.msk.f32.mxu1 %vm3643_vm12, %v2883_v16  ;;  %vm3664_vm2 = vmmov %vm3650_vm0 }
 0x400   :  { %1738 = vrot.lane.b32.xlu0 %v1502_v63, %s2896_s2  ;;  %2700 = vmatprep.subr.mxu1 %v2883_v16 }
 0x401   :  { %v897_v5 = vpop.permute.xlu1 %896 }
 0x402   :  { %2693 = vmatmul.mubr.msk.f32.vlgmr.msra.gmra.mrb[8].mxu1 %vm3650_vm0, %v739_v3  ;;  %vm3665_vm0 = vmmov %vm3663_vm1 }
 0x403   :  { %2701 = vmatpush3.msk.msra.mxu1 %vm3651_vm10, %v899_v4  ;;  %2702 = vmatprep.mubr.msk.f32.mxu1 %vm3643_vm12, %v2883_v16  ;;  %vm3666_vm10 = vmmov %vm3664_vm2 }
 0x404   :  { %1817 = vrot.lane.b32.xlu0 %v1502_v63, %s2901_s7  ;;  %2715 = vmatprep.subr.mxu1 %v2883_v16 }
 0x405   :  { %v1505_v8 = vpop.permute.xlu1 %1504 }
 0x406   :  { %2703 = vmatmul.mubr.msk.f32.vlgmr.msra.gmra.mrb[10].mxu1 %vm3652_vm3, %v897_v5  ;;  %vm3667_vm3 = vmmov %vm3665_vm0 }
 0x407   :  { %2717 = vmatprep.mubr.msk.f32.mxu1 %vm3643_vm12, %v2883_v16 }
 0x408   :  { %1896 = vrot.lane.b32.xlu0 %v1502_v63, %s2892_s24 }
 0x409   :  { %v1658_v9 = vpop.permute.xlu1 %1657 }
 0x40c   :  { %1975 = vrot.lane.b32.xlu0 %v1502_v63, %s2893_s27 }
 0x40d   :  { %v1737_v10 = vpop.permute.xlu1 %1736 }
 0x410   :  { %2054 = vrot.lane.b32.xlu0 %v1502_v63, %s2897_s29 }
 0x411   :  { %v1816_v14 = vpop.permute.xlu1 %1815 }
 0x414   :  { %2133 = vrot.lane.b32.xlu0 %v1502_v63, %s2903_s9 }
 0x418   :  { %978 = vperm.xlu0 %2804, %v3204_v7  }
 0x46a   :  { %v1508_v11 = vpop.permute.xlu0 %1507 }
 0x46b   :  { %2716 = vmatpush3.msk.msra.mxu1 %vm3653_vm4, %v1508_v11  ;;  %vm3668_vm4 = vmmov %vm3664_vm2 }
 0x46c   :  { %2720 = vmatprep.subr.mxu1 %v2883_v16  ;;  %2718 = vmatmul.mubr.msk.f32.vlgmr.msra.gmra.mrb[12].mxu1 %vm3654_vm5, %v1505_v8  ;;  %vm3669_vm5 = vmmov %vm3665_vm0 }
 0x46d   :  { %2721 = vmatpush3.msk.msra.mxu1 %vm3655_vm6, %v1502_v63  ;;  %2722 = vmatprep.mubr.msk.f32.mxu1 %vm3643_vm12, %v2883_v16  ;;  %vm3670_vm6 = vmmov %vm3664_vm2 }
 0x46e   :  { %v1660_v12 = vpop.permute.xlu0 %1659  ;;  %2730 = vmatprep.subr.mxu1 %v2883_v16 }
 0x46f   :  { %2726 = vmatpush3.msk.msra.mxu0 %vm3656_vm7, %v1660_v12 }
 0x470   :  { %2723 = vmatmul.mubr.msk.f32.vlgmr.msra.gmra.mrb[14].mxu1 %vm3657_vm8, %v3020_v44  ;;  %2735 = vmatprep.subr.mxu0 %v2883_v16  ;;  %v1895_v44 = vpop.permute.xlu1 %1894 }
 0x471   :  { %2728 = vmatmul.mubr.msk.f32.vlgmr.msra.gmra.mrb[14].mxu0 %vm3658_vm11, %v1658_v9  ;;  %2732 = vmatprep.mubr.msk.f32.mxu1 %vm3643_vm12, %v2883_v16 }
 0x472   :  { %v1739_v17 = vpop.permute.xlu0 %1738  ;;  %2737 = vmatprep.mubr.msk.f32.mxu0 %vm3643_vm12, %v2883_v16 }
 0x473   :  { %2731 = vmatpush3.msk.msra.mxu1 %vm3659_vm9, %v1739_v17 }
 0x474   :  { %2740 = vmatprep.subr.mxu1 %v2883_v16  ;;  %2733 = vmatmul.mubr.msk.f32.vlgmr.msra.gmra.mrb[16].mxu1 %vm3660_vm13, %v1737_v10  ;;  %v1974_v20 = vpop.permute.xlu1 %1973 }
 0x475   :  { %2742 = vmatprep.mubr.msk.f32.mxu1 %vm3643_vm12, %v2883_v16 }
 0x476   :  { %v1818_v18 = vpop.permute.xlu0 %1817 }
 0x477   :  { %2736 = vmatpush3.msk.msra.mxu0 %vm3661_vm14, %v1818_v18 }
 0x478   :  { %2745 = vmatprep.subr.mxu0 %v2883_v16  ;;  %2738 = vmatmul.mubr.msk.f32.vlgmr.msra.gmra.mrb[16].mxu0 %vm3662_vm15, %v1816_v14  ;;  %v2053_v22 = vpop.permute.xlu1 %2052 }
 0x479   :  { %2747 = vmatprep.mubr.msk.f32.mxu0 %vm3643_vm12, %v2883_v16 }
 0x47a   :  { %v1897_v19 = vpop.permute.xlu0 %1896 }
 0x47b   :  { %2741 = vmatpush3.msk.msra.mxu1 %vm3663_vm1, %v1897_v19 }
 0x47c   :  { %2750 = vmatprep.subr.mxu1 %v2883_v16  ;;  %2743 = vmatmul.mubr.msk.f32.vlgmr.msra.gmra.mrb[18].mxu1 %vm3664_vm2, %v1895_v44  ;;  %v2132_v24 = vpop.permute.xlu1 %2131 }
 0x47d   :  { %2752 = vmatprep.mubr.msk.f32.mxu1 %vm3643_vm12, %v2883_v16 }
 0x47e   :  { %v1976_v21 = vpop.permute.xlu0 %1975 }
 0x47f   :  { %2746 = vmatpush3.msk.msra.mxu0 %vm3665_vm0, %v1976_v21 }
 0x480   :  { %2755 = vmatprep.subr.mxu0 %v2883_v16  ;;  %2748 = vmatmul.mubr.msk.f32.vlgmr.msra.gmra.mrb[18].mxu0 %vm3666_vm10, %v1974_v20 }
 0x481   :  { %2757 = vmatprep.mubr.msk.f32.mxu0 %vm3643_vm12, %v2883_v16  ;;  %vm1040_vm12 = vcmask 57344  }
 0x482   :  { %v2055_v23 = vpop.permute.xlu0 %2054 }
 0x483   :  { %2751 = vmatpush3.msk.msra.mxu1 %vm3667_vm3, %v2055_v23 }
 0x484   :  { %2753 = vmatmul.mubr.msk.f32.vlgmr.msra.gmra.mrb[20].mxu1 %vm3668_vm4, %v2053_v22 }
 0x486   :  { %v2134_v25 = vpop.permute.xlu0 %2133 }
 0x487   :  { %2756 = vmatpush3.msk.msra.mxu0 %vm3669_vm5, %v2134_v25 }
 0x488   :  { %2758 = vmatmul.mubr.msk.f32.vlgmr.msra.gmra.mrb[20].mxu0 %vm3670_vm6, %v2132_v24 }
 0x497   :  { %v979_v49 = vpop.permute.xlu0 %978 }
 0x4c5   :  { %v344_v26 = vpop.f32.mrb[0].mxu1 }
 0x4c6   :  { %v2664_v27 = vpop.f32.mrb[1].mxu1 }
 0x4c9   :  { %v418_v28 = vpop.f32.mrb[2].mxu1 }
 0x4ca   :  { %v419_v29 = vadd.f32 %v418_v28, %v344_v26  ;;  %v2669_v30 = vpop.f32.mrb[3].mxu1 }
 0x4cd   :  { %v496_v31 = vpop.f32.mrb[4].mxu1 }
 0x4ce   :  { %v500_v32 = vadd.f32 %v496_v31, %v419_v29  ;;  %v2674_v33 = vpop.f32.mrb[5].mxu1 }
 0x4d0   :  { %v579_v16 = vadd.f32 %v3084_v6, %v500_v32 }
 0x4d1   :  { %v654_v34 = vpop.f32.mrb[6].mxu1 }
 0x4d2   :  { %v658_v35 = vadd.f32 %v654_v34, %v579_v16  ;;  %v2684_v36 = vpop.f32.mrb[7].mxu1 }
 0x4d4   :  { %v737_v40 = vadd.f32 %v3086_v13, %v658_v35 }
 0x4d5   :  { %v812_v41 = vpop.f32.mrb[8].mxu1 }
 0x4d6   :  { %v816_v42 = vadd.f32 %v812_v41, %v737_v40  ;;  %v2694_v43 = vpop.f32.mrb[9].mxu1 }
 0x4d8   :  { %v895_v47 = vadd.f32 %v3088_v15, %v816_v42 }
 0x4d9   :  { %v970_v48 = vpop.f32.mrb[10].mxu1 }
 0x4da   :  { %v974_v50 = vadd.f32 %v970_v48, %v895_v47  ;;  %v2704_v6 = vpop.f32.mrb[11].mxu1 }
 0x4dc   :  { %v981_v52 = vadd.f32 %v979_v49, %v974_v50 }
 0x4de   :  { %v983_v53 = vcombine.high %v981_v52, %v981_v52  ;;  %v990_v54 = vrot.slane %v981_v52, %v3250_v51 }
 0x4e0   :  { %v997_v13 = vrot.slane %v983_v53, %v3250_v51  ;;  %v998_v56 = vcombine.high %v990_v54, %v990_v54  ;;  %v1006_v57 = vrot.slane %v990_v54, %v3250_v51 }
 0x4e2   :  { %v999_v59 = vcombine.high %v997_v13, %v997_v13  ;;  %v1013_v15 = vrot.slane %v997_v13, %v3250_v51  ;;  %v1020_v60 = vrot.slane %v998_v56, %v3250_v51  ;;  %v1028_v61 = vcombine.high %v1006_v57, %v1006_v57  ;;  %1041 = vst.msk [vmem:[#allocation8] sm:$0x1] %vm1040_vm12, %v1006_v57 }
 0x4e3   :  { %v3261_v62 = vrot.slane %v1006_v57, %v3253_v55 }
 0x4e4   :  { %v1027_v63 = vrot.slane %v999_v59, %v3250_v51  ;;  %v1029_v0 = vcombine.high %v1013_v15, %v1013_v15  ;;  %v1030_v1 = vcombine.high %v1020_v60, %v1020_v60  ;;  %1042 = vst.msk [vmem:[#allocation8 + $0x8] sm:$0x1] %vm1040_vm12, %v1020_v60  ;;  %1043 = vst.msk [vmem:[#allocation8 + $0x10] sm:$0x1] %vm1040_vm12, %v1028_v61 }
 0x4e5   :  { %1045 = vst.msk [vmem:[#allocation8 + $0x20] sm:$0x1] %vm1040_vm12, %v1013_v15  ;;  %v3268_v58 = vrot.slane %v1028_v61, %v3253_v55  ;;  %1081 = vrot.lane.b32.xlu1 %v3261_v62, %s2896_s2  ;;  %v3276_v3 = vrot.slane %v1020_v60, %v3253_v55  ;;  %v3282_v4 = vrot.slane %v1013_v15, %v3253_v55 }
 0x4e6   :  { %v1031_v2 = vcombine.high %v1027_v63, %v1027_v63  ;;  %1044 = vst.msk [vmem:[#allocation8 + $0x18] sm:$0x1] %vm1040_vm12, %v1030_v1  ;;  %1046 = vst.msk [vmem:[#allocation8 + $0x28] sm:$0x1] %vm1040_vm12, %v1027_v63  ;;  %v3287_v5 = vrot.slane %v1030_v1, %v3253_v55  ;;  %v3292_v8 = vrot.slane %v1029_v0, %v3253_v55 }
 0x4e7   :  { %1047 = vst.msk [vmem:[#allocation8 + $0x30] sm:$0x1] %vm1040_vm12, %v1029_v0  ;;  %1085 = vrot.lane.b32.xlu0 %v3268_v58, %s2896_s2  ;;  %v3297_v9 = vrot.slane %v1027_v63, %v3253_v55 }
 0x4e8   :  { %1048 = vst.msk [vmem:[#allocation8 + $0x38] sm:$0x1] %vm1040_vm12, %v1031_v2  ;;  %v3304_v10 = vrot.slane %v1031_v2, %v3253_v55 }
 0x4e9   :  { %1083 = vrot.lane.b32.xlu1 %v3276_v3, %s2896_s2 }
 0x4eb   :  { %1089 = vrot.lane.b32.xlu0 %v3282_v4, %s2896_s2 }
 0x4ed   :  { %1087 = vrot.lane.b32.xlu1 %v3287_v5, %s2896_s2 }
 0x4ef   :  { %1093 = vrot.lane.b32.xlu0 %v3292_v8, %s2896_s2 }
 0x4f1   :  { %1091 = vrot.lane.b32.xlu1 %v3297_v9, %s2896_s2 }
 0x4f3   :  { %1113 = vrot.lane.b32.xlu0 %v3261_v62, %s2893_s27 }
 0x4f5   :  { %1095 = vrot.lane.b32.xlu1 %v3304_v10, %s2896_s2 }
 0x4f7   :  { %1117 = vrot.lane.b32.xlu0 %v3268_v58, %s2893_s27 }
 0x4f9   :  { %1115 = vrot.lane.b32.xlu1 %v3276_v3, %s2893_s27 }
 0x4fb   :  { %1121 = vrot.lane.b32.xlu0 %v3282_v4, %s2893_s27 }
 0x4fd   :  { %1119 = vrot.lane.b32.xlu1 %v3287_v5, %s2893_s27 }
 0x4ff   :  { %1125 = vrot.lane.b32.xlu0 %v3292_v8, %s2893_s27 }
 0x501   :  { %1123 = vrot.lane.b32.xlu1 %v3297_v9, %s2893_s27 }
 0x503   :  { %1145 = vrot.lane.b32.xlu0 %v3261_v62, %s2908_s3 }
 0x505   :  { %1127 = vrot.lane.b32.xlu1 %v3304_v10, %s2893_s27 }
 0x507   :  { %1149 = vrot.lane.b32.xlu0 %v3268_v58, %s2908_s3 }
 0x509   :  { %1147 = vrot.lane.b32.xlu1 %v3276_v3, %s2908_s3 }
 0x50b   :  { %1153 = vrot.lane.b32.xlu0 %v3282_v4, %s2908_s3 }
 0x50d   :  { %1151 = vrot.lane.b32.xlu1 %v3287_v5, %s2908_s3 }
 0x50f   :  { %1157 = vrot.lane.b32.xlu0 %v3292_v8, %s2908_s3 }
 0x511   :  { %1155 = vrot.lane.b32.xlu1 %v3297_v9, %s2908_s3 }
 0x513   :  { %1177 = vrot.lane.b32.xlu0 %v3261_v62, %s2909_s13 }
 0x515   :  { %1159 = vrot.lane.b32.xlu1 %v3304_v10, %s2908_s3 }
 0x517   :  { %1181 = vrot.lane.b32.xlu0 %v3268_v58, %s2909_s13 }
 0x519   :  { %1179 = vrot.lane.b32.xlu1 %v3276_v3, %s2909_s13 }
 0x51b   :  { %1185 = vrot.lane.b32.xlu0 %v3282_v4, %s2909_s13 }
 0x51d   :  { %1183 = vrot.lane.b32.xlu1 %v3287_v5, %s2909_s13 }
 0x51f   :  { %1189 = vrot.lane.b32.xlu0 %v3292_v8, %s2909_s13 }
 0x521   :  { %1187 = vrot.lane.b32.xlu1 %v3297_v9, %s2909_s13 }
 0x523   :  { %1209 = vrot.lane.b32.xlu0 %v3261_v62, %s2910_s14 }
 0x525   :  { %1191 = vrot.lane.b32.xlu1 %v3304_v10, %s2909_s13 }
 0x527   :  { %1213 = vrot.lane.b32.xlu0 %v3268_v58, %s2910_s14 }
 0x529   :  { %1211 = vrot.lane.b32.xlu1 %v3276_v3, %s2910_s14 }
 0x52b   :  { %1217 = vrot.lane.b32.xlu0 %v3282_v4, %s2910_s14 }
 0x52d   :  { %1215 = vrot.lane.b32.xlu1 %v3287_v5, %s2910_s14 }
 0x52f   :  { %1221 = vrot.lane.b32.xlu0 %v3292_v8, %s2910_s14 }
 0x531   :  { %1219 = vrot.lane.b32.xlu1 %v3297_v9, %s2910_s14 }
 0x533   :  { %1241 = vrot.lane.b32.xlu0 %v3261_v62, %s2911_s1 }
 0x535   :  { %1223 = vrot.lane.b32.xlu1 %v3304_v10, %s2910_s14 }
 0x537   :  { %1245 = vrot.lane.b32.xlu0 %v3268_v58, %s2911_s1 }
 0x539   :  { %1243 = vrot.lane.b32.xlu1 %v3276_v3, %s2911_s1 }
 0x53b   :  { %1249 = vrot.lane.b32.xlu0 %v3282_v4, %s2911_s1 }
 0x53d   :  { %1247 = vrot.lane.b32.xlu1 %v3287_v5, %s2911_s1 }
 0x53f   :  { %v1579_v11 = vpop.f32.mrb[12].mxu1  ;;  %1251 = vrot.lane.b32.xlu0 %v3297_v9, %s2911_s1 }
 0x540   :  { %v2719_v12 = vpop.f32.mrb[13].mxu1 }
 0x541   :  { %2213 = vperm.xlu1 %2805, %v3204_v7  }
 0x543   :  { %v1653_v14 = vpop.f32.mrb[14].mxu1  ;;  %1255 = vrot.lane.b32.xlu0 %v3304_v10, %s2911_s1 }
 0x544   :  { %v1654_v17 = vadd.f32 %v1653_v14, %v1579_v11  ;;  %v1731_v44 = vpop.f32.mrb[14].mxu0  ;;  %v2724_v18 = vpop.f32.mrb[15].mxu1 }
 0x545   :  { %v2729_v19 = vpop.f32.mrb[15].mxu0  ;;  %1253 = vrot.lane.b32.xlu1 %v3292_v8, %s2911_s1 }
 0x546   :  { %v1735_v20 = vadd.f32 %v1731_v44, %v1654_v17 }
 0x547   :  { %v1810_v21 = vpop.f32.mrb[16].mxu1  ;;  %1275 = vrot.lane.b32.xlu0 %v3276_v3, %s2912_s15 }
 0x548   :  { %v1814_v22 = vadd.f32 %v1810_v21, %v1735_v20  ;;  %v2734_v23 = vpop.f32.mrb[17].mxu1 }
 0x549   :  { %1273 = vrot.lane.b32.xlu1 %v3261_v62, %s2912_s15 }
 0x54b   :  { %v1889_v7 = vpop.f32.mrb[16].mxu0  ;;  %1279 = vrot.lane.b32.xlu0 %v3287_v5, %s2912_s15 }
 0x54c   :  { %v1893_v24 = vadd.f32 %v1889_v7, %v1814_v22  ;;  %v2739_v25 = vpop.f32.mrb[17].mxu0 }
 0x54d   :  { %1277 = vrot.lane.b32.xlu1 %v3268_v58, %s2912_s15 }
 0x54f   :  { %v1968_v26 = vpop.f32.mrb[18].mxu1  ;;  %1283 = vrot.lane.b32.xlu0 %v3297_v9, %s2912_s15 }
 0x550   :  { %v1972_v27 = vadd.f32 %v1968_v26, %v1893_v24  ;;  %v2744_v28 = vpop.f32.mrb[19].mxu1 }
 0x551   :  { %1281 = vrot.lane.b32.xlu1 %v3282_v4, %s2912_s15 }
 0x553   :  { %v2047_v29 = vpop.f32.mrb[18].mxu0  ;;  %1287 = vrot.lane.b32.xlu0 %v3304_v10, %s2912_s15 }
 0x554   :  { %v2051_v30 = vadd.f32 %v2047_v29, %v1972_v27  ;;  %v2749_v31 = vpop.f32.mrb[19].mxu0 }
 0x555   :  { %1285 = vrot.lane.b32.xlu1 %v3292_v8, %s2912_s15 }
 0x557   :  { %v2126_v32 = vpop.f32.mrb[20].mxu1  ;;  %v1082_v34 = vpop.permute.xlu1 %1081 }
 0x558   :  { %v2130_v33 = vadd.f32 %v2126_v32, %v2051_v30  ;;  %v2754_v16 = vpop.f32.mrb[21].mxu1  ;;  %1105 = vst.msk [vmem:[#allocation8 + $0x1] sm:$0x1] %vm1040_vm12, %v1082_v34 }
 0x559   :  { %v1086_v35 = vpop.permute.xlu0 %1085 }
 0x55a   :  { %1107 = vst.msk [vmem:[#allocation8 + $0x11] sm:$0x1] %vm1040_vm12, %v1086_v35 }
 0x55b   :  { %v2205_v36 = vpop.f32.mrb[20].mxu0  ;;  %v1084_v39 = vpop.permute.xlu1 %1083 }
 0x55c   :  { %v3407_v37 = vadd.f32 %v2205_v36, %v2130_v33  ;;  %v2759_v38 = vpop.f32.mrb[21].mxu0  ;;  %1106 = vst.msk [vmem:[#allocation8 + $0x9] sm:$0x1] %vm1040_vm12, %v1084_v39 }
 0x55d   :  { %v1090_v40 = vpop.permute.xlu0 %1089 }
 0x55e   :  { %1109 = vst.msk [vmem:[#allocation8 + $0x21] sm:$0x1] %vm1040_vm12, %v1090_v40 }
 0x55f   :  { %v1088_v41 = vpop.permute.xlu1 %1087 }
 0x560   :  { %1108 = vst.msk [vmem:[#allocation8 + $0x19] sm:$0x1] %vm1040_vm12, %v1088_v41 }
 0x561   :  { %v1094_v42 = vpop.permute.xlu0 %1093 }
 0x562   :  { %1111 = vst.msk [vmem:[#allocation8 + $0x31] sm:$0x1] %vm1040_vm12, %v1094_v42 }
 0x563   :  { %v1092_v43 = vpop.permute.xlu1 %1091 }
 0x564   :  { %1110 = vst.msk [vmem:[#allocation8 + $0x29] sm:$0x1] %vm1040_vm12, %v1092_v43 }
 0x565   :  { %v1114_v45 = vpop.permute.xlu0 %1113 }
 0x566   :  { %1137 = vst.msk [vmem:[#allocation8 + $0x2] sm:$0x1] %vm1040_vm12, %v1114_v45 }
 0x567   :  { %v1096_v46 = vpop.permute.xlu1 %1095 }
 0x568   :  { %1112 = vst.msk [vmem:[#allocation8 + $0x39] sm:$0x1] %vm1040_vm12, %v1096_v46 }
 0x569   :  { %v1118_v47 = vpop.permute.xlu0 %1117 }
 0x56a   :  { %1139 = vst.msk [vmem:[#allocation8 + $0x12] sm:$0x1] %vm1040_vm12, %v1118_v47 }
 0x56b   :  { %v1116_v48 = vpop.permute.xlu1 %1115 }
 0x56c   :  { %1138 = vst.msk [vmem:[#allocation8 + $0xa] sm:$0x1] %vm1040_vm12, %v1116_v48 }
 0x56d   :  { %v1122_v49 = vpop.permute.xlu0 %1121 }
 0x56e   :  { %1141 = vst.msk [vmem:[#allocation8 + $0x22] sm:$0x1] %vm1040_vm12, %v1122_v49 }
 0x56f   :  { %v1120_v50 = vpop.permute.xlu1 %1119 }
 0x570   :  { %1140 = vst.msk [vmem:[#allocation8 + $0x1a] sm:$0x1] %vm1040_vm12, %v1120_v50 }
 0x571   :  { %v1126_v6 = vpop.permute.xlu0 %1125 }
 0x572   :  { %1143 = vst.msk [vmem:[#allocation8 + $0x32] sm:$0x1] %vm1040_vm12, %v1126_v6 }
 0x573   :  { %v1124_v52 = vpop.permute.xlu1 %1123 }
 0x574   :  { %1142 = vst.msk [vmem:[#allocation8 + $0x2a] sm:$0x1] %vm1040_vm12, %v1124_v52 }
 0x575   :  { %v1146_v53 = vpop.permute.xlu0 %1145 }
 0x576   :  { %1169 = vst.msk [vmem:[#allocation8 + $0x3] sm:$0x1] %vm1040_vm12, %v1146_v53 }
 0x577   :  { %v1128_v54 = vpop.permute.xlu1 %1127 }
 0x578   :  { %1144 = vst.msk [vmem:[#allocation8 + $0x3a] sm:$0x1] %vm1040_vm12, %v1128_v54 }
 0x579   :  { %v1150_v13 = vpop.permute.xlu0 %1149 }
 0x57a   :  { %1171 = vst.msk [vmem:[#allocation8 + $0x13] sm:$0x1] %vm1040_vm12, %v1150_v13 }
 0x57b   :  { %v1148_v56 = vpop.permute.xlu1 %1147 }
 0x57c   :  { %1170 = vst.msk [vmem:[#allocation8 + $0xb] sm:$0x1] %vm1040_vm12, %v1148_v56 }
 0x57d   :  { %v1154_v57 = vpop.permute.xlu0 %1153 }
 0x57e   :  { %1173 = vst.msk [vmem:[#allocation8 + $0x23] sm:$0x1] %vm1040_vm12, %v1154_v57 }
 0x57f   :  { %v1152_v59 = vpop.permute.xlu1 %1151 }
 0x580   :  { %1172 = vst.msk [vmem:[#allocation8 + $0x1b] sm:$0x1] %vm1040_vm12, %v1152_v59 }
 0x581   :  { %v1158_v15 = vpop.permute.xlu0 %1157 }
 0x582   :  { %1175 = vst.msk [vmem:[#allocation8 + $0x33] sm:$0x1] %vm1040_vm12, %v1158_v15 }
 0x583   :  { %v1156_v60 = vpop.permute.xlu1 %1155 }
 0x584   :  { %1174 = vst.msk [vmem:[#allocation8 + $0x2b] sm:$0x1] %vm1040_vm12, %v1156_v60 }
 0x585   :  { %v1178_v61 = vpop.permute.xlu0 %1177 }
 0x586   :  { %1201 = vst.msk [vmem:[#allocation8 + $0x4] sm:$0x1] %vm1040_vm12, %v1178_v61 }
 0x587   :  { %v1160_v62 = vpop.permute.xlu1 %1159 }
 0x588   :  { %1176 = vst.msk [vmem:[#allocation8 + $0x3b] sm:$0x1] %vm1040_vm12, %v1160_v62 }
 0x589   :  { %v1182_v63 = vpop.permute.xlu0 %1181 }
 0x58a   :  { %1203 = vst.msk [vmem:[#allocation8 + $0x14] sm:$0x1] %vm1040_vm12, %v1182_v63 }
 0x58b   :  { %v1180_v0 = vpop.permute.xlu1 %1179 }
 0x58c   :  { %1202 = vst.msk [vmem:[#allocation8 + $0xc] sm:$0x1] %vm1040_vm12, %v1180_v0 }
 0x58d   :  { %v1186_v1 = vpop.permute.xlu0 %1185 }
 0x58e   :  { %1205 = vst.msk [vmem:[#allocation8 + $0x24] sm:$0x1] %vm1040_vm12, %v1186_v1 }
 0x58f   :  { %v1184_v58 = vpop.permute.xlu1 %1183 }
 0x590   :  { %1204 = vst.msk [vmem:[#allocation8 + $0x1c] sm:$0x1] %vm1040_vm12, %v1184_v58 }
 0x591   :  { %v1190_v2 = vpop.permute.xlu0 %1189 }
 0x592   :  { %1207 = vst.msk [vmem:[#allocation8 + $0x34] sm:$0x1] %vm1040_vm12, %v1190_v2 }
 0x593   :  { %v1188_v3 = vpop.permute.xlu1 %1187 }
 0x594   :  { %1206 = vst.msk [vmem:[#allocation8 + $0x2c] sm:$0x1] %vm1040_vm12, %v1188_v3 }
 0x595   :  { %v1210_v4 = vpop.permute.xlu0 %1209 }
 0x596   :  { %1233 = vst.msk [vmem:[#allocation8 + $0x5] sm:$0x1] %vm1040_vm12, %v1210_v4 }
 0x597   :  { %v1192_v5 = vpop.permute.xlu1 %1191 }
 0x598   :  { %1208 = vst.msk [vmem:[#allocation8 + $0x3c] sm:$0x1] %vm1040_vm12, %v1192_v5 }
 0x599   :  { %v1214_v8 = vpop.permute.xlu0 %1213 }
 0x59a   :  { %1235 = vst.msk [vmem:[#allocation8 + $0x15] sm:$0x1] %vm1040_vm12, %v1214_v8 }
 0x59b   :  { %v1212_v9 = vpop.permute.xlu1 %1211 }
 0x59c   :  { %1234 = vst.msk [vmem:[#allocation8 + $0xd] sm:$0x1] %vm1040_vm12, %v1212_v9 }
 0x59d   :  { %v1218_v10 = vpop.permute.xlu0 %1217 }
 0x59e   :  { %1237 = vst.msk [vmem:[#allocation8 + $0x25] sm:$0x1] %vm1040_vm12, %v1218_v10 }
 0x59f   :  { %v1216_v11 = vpop.permute.xlu1 %1215 }
 0x5a0   :  { %1236 = vst.msk [vmem:[#allocation8 + $0x1d] sm:$0x1] %vm1040_vm12, %v1216_v11 }
 0x5a1   :  { %v1222_v12 = vpop.permute.xlu0 %1221 }
 0x5a2   :  { %1239 = vst.msk [vmem:[#allocation8 + $0x35] sm:$0x1] %vm1040_vm12, %v1222_v12 }
 0x5a3   :  { %v1220_v14 = vpop.permute.xlu1 %1219 }
 0x5a4   :  { %1238 = vst.msk [vmem:[#allocation8 + $0x2d] sm:$0x1] %vm1040_vm12, %v1220_v14 }
 0x5a5   :  { %v1242_v17 = vpop.permute.xlu0 %1241 }
 0x5a6   :  { %1265 = vst.msk [vmem:[#allocation8 + $0x6] sm:$0x1] %vm1040_vm12, %v1242_v17 }
 0x5a7   :  { %v1224_v44 = vpop.permute.xlu1 %1223 }
 0x5a8   :  { %1240 = vst.msk [vmem:[#allocation8 + $0x3d] sm:$0x1] %vm1040_vm12, %v1224_v44 }
 0x5a9   :  { %v1246_v18 = vpop.permute.xlu0 %1245 }
 0x5aa   :  { %1267 = vst.msk [vmem:[#allocation8 + $0x16] sm:$0x1] %vm1040_vm12, %v1246_v18 }
 0x5ab   :  { %v1244_v19 = vpop.permute.xlu1 %1243 }
 0x5ac   :  { %1266 = vst.msk [vmem:[#allocation8 + $0xe] sm:$0x1] %vm1040_vm12, %v1244_v19 }
 0x5ad   :  { %v1250_v20 = vpop.permute.xlu0 %1249 }
 0x5ae   :  { %1269 = vst.msk [vmem:[#allocation8 + $0x26] sm:$0x1] %vm1040_vm12, %v1250_v20 }
 0x5af   :  { %v1248_v21 = vpop.permute.xlu1 %1247 }
 0x5b0   :  { %1268 = vst.msk [vmem:[#allocation8 + $0x1e] sm:$0x1] %vm1040_vm12, %v1248_v21 }
 0x5b1   :  { %v1252_v22 = vpop.permute.xlu0 %1251 }
 0x5b2   :  { %1270 = vst.msk [vmem:[#allocation8 + $0x2e] sm:$0x1] %vm1040_vm12, %v1252_v22 }
 0x5b5   :  { %v1256_v23 = vpop.permute.xlu0 %1255 }
 0x5b6   :  { %1272 = vst.msk [vmem:[#allocation8 + $0x3e] sm:$0x1] %vm1040_vm12, %v1256_v23 }
 0x5b9   :  { %v1276_v7 = vpop.permute.xlu0 %1275 }
 0x5ba   :  { %1298 = vst.msk [vmem:[#allocation8 + $0xf] sm:$0x1] %vm1040_vm12, %v1276_v7 }
 0x5bd   :  { %v1280_v24 = vpop.permute.xlu0 %1279 }
 0x5be   :  { %1300 = vst.msk [vmem:[#allocation8 + $0x1f] sm:$0x1] %vm1040_vm12, %v1280_v24 }
 0x5c0   :  { %v2214_v25 = vpop.permute.xlu1 %2213 }
 0x5c1   :  { %v2216_v26 = vadd.f32 %v2214_v25, %v3407_v37  ;;  %v1284_v27 = vpop.permute.xlu0 %1283 }
 0x5c2   :  { %1302 = vst.msk [vmem:[#allocation8 + $0x2f] sm:$0x1] %vm1040_vm12, %v1284_v27 }
 0x5c3   :  { %v2218_v28 = vcombine.high %v2216_v26, %v2216_v26  ;;  %v2225_v29 = vrot.slane %v2216_v26, %v3250_v51 }
 0x5c4   :  { %v1254_v30 = vpop.permute.xlu1 %1253 }
 0x5c5   :  { %v2232_v31 = vrot.slane %v2218_v28, %v3250_v51  ;;  %v2233_v32 = vcombine.high %v2225_v29, %v2225_v29  ;;  %v2241_v33 = vrot.slane %v2225_v29, %v3250_v51  ;;  %1271 = vst.msk [vmem:[#allocation8 + $0x36] sm:$0x1] %vm1040_vm12, %v1254_v30  ;;  %v1288_v16 = vpop.permute.xlu0 %1287 }
 0x5c6   :  { %1304 = vst.msk [vmem:[#allocation8 + $0x3f] sm:$0x1] %vm1040_vm12, %v1288_v16 }
 0x5c7   :  { %v2234_v34 = vcombine.high %v2232_v31, %v2232_v31  ;;  %v2248_v35 = vrot.slane %v2232_v31, %v3250_v51  ;;  %v2255_v36 = vrot.slane %v2233_v32, %v3250_v51  ;;  %v2263_v37 = vcombine.high %v2241_v33, %v2241_v33  ;;  %2276 = vst.msk [vmem:[#allocation8 + $0x40] sm:$0x1] %vm1040_vm12, %v2241_v33 }
 0x5c8   :  { %v2287_v38 = vrot.slane %v2241_v33, %v3253_v55  ;;  %v1274_v39 = vpop.permute.xlu1 %1273 }
 0x5c9   :  { %v2262_v40 = vrot.slane %v2234_v34, %v3250_v51  ;;  %v3468_v41 = vcombine.high %v2248_v35, %v2248_v35  ;;  %v2265_v42 = vcombine.high %v2255_v36, %v2255_v36  ;;  %2277 = vst.msk [vmem:[#allocation8 + $0x48] sm:$0x1] %vm1040_vm12, %v2255_v36  ;;  %2278 = vst.msk [vmem:[#allocation8 + $0x50] sm:$0x1] %vm1040_vm12, %v2263_v37 }
 0x5ca   :  { %2280 = vst.msk [vmem:[#allocation8 + $0x60] sm:$0x1] %vm1040_vm12, %v2248_v35  ;;  %v2291_v43 = vrot.slane %v2255_v36, %v3253_v55  ;;  %1297 = vst.msk [vmem:[#allocation8 + $0x7] sm:$0x1] %vm1040_vm12, %v1274_v39  ;;  %2316 = vrot.lane.b32.xlu1 %v2287_v38, %s2896_s2  ;;  %v2295_v48 = vrot.slane %v2263_v37, %v3253_v55  ;;  %v2303_v50 = vrot.slane %v2248_v35, %v3253_v55 }
 0x5cb   :  { %v2266_v45 = vcombine.high %v2262_v40, %v2262_v40  ;;  %2279 = vst.msk [vmem:[#allocation8 + $0x58] sm:$0x1] %vm1040_vm12, %v2265_v42  ;;  %2281 = vst.msk [vmem:[#allocation8 + $0x68] sm:$0x1] %vm1040_vm12, %v2262_v40  ;;  %v2299_v49 = vrot.slane %v2265_v42, %v3253_v55  ;;  %v2307_v6 = vrot.slane %v2262_v40, %v3253_v55 }
 0x5cc   :  { %2282 = vst.msk [vmem:[#allocation8 + $0x70] sm:$0x1] %vm1040_vm12, %v3468_v41  ;;  %2318 = vrot.lane.b32.xlu0 %v2291_v43, %s2896_s2  ;;  %v1278_v51 = vpop.permute.xlu1 %1277  ;;  %v2311_v52 = vrot.slane %v3468_v41, %v3253_v55 }
 0x5cd   :  { %2283 = vst.msk [vmem:[#allocation8 + $0x78] sm:$0x1] %vm1040_vm12, %v2266_v45  ;;  %1299 = vst.msk [vmem:[#allocation8 + $0x17] sm:$0x1] %vm1040_vm12, %v1278_v51  ;;  %v2315_v53 = vrot.slane %v2266_v45, %v3253_v55 }
 0x5ce   :  { %2348 = vrot.lane.b32.xlu1 %v2287_v38, %s2893_s27 }
 0x5d0   :  { %2350 = vrot.lane.b32.xlu0 %v2291_v43, %s2893_s27  ;;  %v1282_v46 = vpop.permute.xlu1 %1281 }
 0x5d1   :  { %1301 = vst.msk [vmem:[#allocation8 + $0x27] sm:$0x1] %vm1040_vm12, %v1282_v46 }
 0x5d2   :  { %2380 = vrot.lane.b32.xlu1 %v2287_v38, %s2908_s3 }
 0x5d4   :  { %2382 = vrot.lane.b32.xlu0 %v2291_v43, %s2908_s3  ;;  %v1286_v47 = vpop.permute.xlu1 %1285 }
 0x5d5   :  { %1303 = vst.msk [vmem:[#allocation8 + $0x37] sm:$0x1] %vm1040_vm12, %v1286_v47 }
 0x5d6   :  { %2412 = vrot.lane.b32.xlu1 %v2287_v38, %s2909_s13 }
 0x5d8   :  { %2414 = vrot.lane.b32.xlu0 %v2291_v43, %s2909_s13 }
 0x5da   :  { %2444 = vrot.lane.b32.xlu1 %v2287_v38, %s2910_s14 }
 0x5dc   :  { %2446 = vrot.lane.b32.xlu0 %v2291_v43, %s2910_s14 }
 0x5de   :  { %2476 = vrot.lane.b32.xlu1 %v2287_v38, %s2911_s1 }
 0x5e0   :  { %2478 = vrot.lane.b32.xlu0 %v2291_v43, %s2911_s1 }
 0x5e2   :  { %2508 = vrot.lane.b32.xlu1 %v2287_v38, %s2912_s15 }
 0x5e4   :  { %2510 = vrot.lane.b32.xlu0 %v2291_v43, %s2912_s15 }
 0x5e6   :  { %2320 = vrot.lane.b32.xlu1 %v2295_v48, %s2896_s2 }
 0x5e8   :  { %2322 = vrot.lane.b32.xlu0 %v2299_v49, %s2896_s2 }
 0x5ea   :  { %2324 = vrot.lane.b32.xlu1 %v2303_v50, %s2896_s2 }
 0x5ec   :  { %2326 = vrot.lane.b32.xlu0 %v2307_v6, %s2896_s2 }
 0x5ee   :  { %2352 = vrot.lane.b32.xlu1 %v2295_v48, %s2893_s27 }
 0x5f0   :  { %2354 = vrot.lane.b32.xlu0 %v2299_v49, %s2893_s27 }
 0x5f2   :  { %2356 = vrot.lane.b32.xlu1 %v2303_v50, %s2893_s27 }
 0x5f4   :  { %2358 = vrot.lane.b32.xlu0 %v2307_v6, %s2893_s27 }
 0x5f6   :  { %2384 = vrot.lane.b32.xlu1 %v2295_v48, %s2908_s3 }
 0x5f8   :  { %2386 = vrot.lane.b32.xlu0 %v2299_v49, %s2908_s3 }
 0x5fa   :  { %2388 = vrot.lane.b32.xlu1 %v2303_v50, %s2908_s3 }
 0x5fc   :  { %2390 = vrot.lane.b32.xlu0 %v2307_v6, %s2908_s3 }
 0x5fe   :  { %2416 = vrot.lane.b32.xlu1 %v2295_v48, %s2909_s13 }
 0x600   :  { %2418 = vrot.lane.b32.xlu0 %v2299_v49, %s2909_s13 }
 0x602   :  { %2420 = vrot.lane.b32.xlu1 %v2303_v50, %s2909_s13 }
 0x604   :  { %2422 = vrot.lane.b32.xlu0 %v2307_v6, %s2909_s13 }
 0x606   :  { %2448 = vrot.lane.b32.xlu1 %v2295_v48, %s2910_s14 }
 0x608   :  { %2450 = vrot.lane.b32.xlu0 %v2299_v49, %s2910_s14 }
 0x60a   :  { %2452 = vrot.lane.b32.xlu1 %v2303_v50, %s2910_s14 }
 0x60c   :  { %2454 = vrot.lane.b32.xlu0 %v2307_v6, %s2910_s14 }
 0x60e   :  { %2480 = vrot.lane.b32.xlu1 %v2295_v48, %s2911_s1 }
 0x610   :  { %2482 = vrot.lane.b32.xlu0 %v2299_v49, %s2911_s1 }
 0x612   :  { %2484 = vrot.lane.b32.xlu1 %v2303_v50, %s2911_s1 }
 0x614   :  { %2486 = vrot.lane.b32.xlu0 %v2307_v6, %s2911_s1 }
 0x616   :  { %2512 = vrot.lane.b32.xlu1 %v2295_v48, %s2912_s15 }
 0x618   :  { %2514 = vrot.lane.b32.xlu0 %v2299_v49, %s2912_s15 }
 0x61a   :  { %2516 = vrot.lane.b32.xlu1 %v2303_v50, %s2912_s15 }
 0x61c   :  { %2518 = vrot.lane.b32.xlu0 %v2307_v6, %s2912_s15 }
 0x61e   :  { %2328 = vrot.lane.b32.xlu1 %v2311_v52, %s2896_s2 }
 0x620   :  { %2330 = vrot.lane.b32.xlu0 %v2315_v53, %s2896_s2 }
 0x622   :  { %2360 = vrot.lane.b32.xlu1 %v2311_v52, %s2893_s27 }
 0x624   :  { %2362 = vrot.lane.b32.xlu0 %v2315_v53, %s2893_s27 }
 0x626   :  { %2392 = vrot.lane.b32.xlu1 %v2311_v52, %s2908_s3 }
 0x628   :  { %2394 = vrot.lane.b32.xlu0 %v2315_v53, %s2908_s3 }
 0x62a   :  { %2424 = vrot.lane.b32.xlu1 %v2311_v52, %s2909_s13 }
 0x62c   :  { %2426 = vrot.lane.b32.xlu0 %v2315_v53, %s2909_s13 }
 0x62e   :  { %2456 = vrot.lane.b32.xlu1 %v2311_v52, %s2910_s14 }
 0x630   :  { %2458 = vrot.lane.b32.xlu0 %v2315_v53, %s2910_s14 }
 0x632   :  { %2488 = vrot.lane.b32.xlu1 %v2311_v52, %s2911_s1 }
 0x634   :  { %2490 = vrot.lane.b32.xlu0 %v2315_v53, %s2911_s1 }
 0x636   :  { %2520 = vrot.lane.b32.xlu1 %v2311_v52, %s2912_s15 }
 0x638   :  { %2522 = vrot.lane.b32.xlu0 %v2315_v53, %s2912_s15 }
 0x63c   :  { %v2317_v55 = vpop.permute.xlu1 %2316 }
 0x63d   :  { %2340 = vst.msk [vmem:[#allocation8 + $0x41] sm:$0x1] %vm1040_vm12, %v2317_v55 }
 0x63e   :  { %v2319_v54 = vpop.permute.xlu0 %2318 }
 0x63f   :  { %2341 = vst.msk [vmem:[#allocation8 + $0x49] sm:$0x1] %vm1040_vm12, %v2319_v54 }
 0x640   :  { %v2349_v13 = vpop.permute.xlu1 %2348 }
 0x641   :  { %2372 = vst.msk [vmem:[#allocation8 + $0x42] sm:$0x1] %vm1040_vm12, %v2349_v13 }
 0x642   :  { %v2351_v56 = vpop.permute.xlu0 %2350 }
 0x643   :  { %2373 = vst.msk [vmem:[#allocation8 + $0x4a] sm:$0x1] %vm1040_vm12, %v2351_v56 }
 0x644   :  { %v2381_v57 = vpop.permute.xlu1 %2380 }
 0x645   :  { %2404 = vst.msk [vmem:[#allocation8 + $0x43] sm:$0x1] %vm1040_vm12, %v2381_v57 }
 0x646   :  { %v2383_v59 = vpop.permute.xlu0 %2382 }
 0x647   :  { %2405 = vst.msk [vmem:[#allocation8 + $0x4b] sm:$0x1] %vm1040_vm12, %v2383_v59 }
 0x648   :  { %v2413_v15 = vpop.permute.xlu1 %2412 }
 0x649   :  { %2436 = vst.msk [vmem:[#allocation8 + $0x44] sm:$0x1] %vm1040_vm12, %v2413_v15 }
 0x64a   :  { %v2415_v60 = vpop.permute.xlu0 %2414 }
 0x64b   :  { %2437 = vst.msk [vmem:[#allocation8 + $0x4c] sm:$0x1] %vm1040_vm12, %v2415_v60 }
 0x64c   :  { %v2445_v61 = vpop.permute.xlu1 %2444 }
 0x64d   :  { %2468 = vst.msk [vmem:[#allocation8 + $0x45] sm:$0x1] %vm1040_vm12, %v2445_v61 }
 0x64e   :  { %v2447_v62 = vpop.permute.xlu0 %2446 }
 0x64f   :  { %2469 = vst.msk [vmem:[#allocation8 + $0x4d] sm:$0x1] %vm1040_vm12, %v2447_v62 }
 0x650   :  { %v2477_v63 = vpop.permute.xlu1 %2476 }
 0x651   :  { %2500 = vst.msk [vmem:[#allocation8 + $0x46] sm:$0x1] %vm1040_vm12, %v2477_v63 }
 0x652   :  { %v2479_v0 = vpop.permute.xlu0 %2478 }
 0x653   :  { %2501 = vst.msk [vmem:[#allocation8 + $0x4e] sm:$0x1] %vm1040_vm12, %v2479_v0 }
 0x654   :  { %v2509_v1 = vpop.permute.xlu1 %2508 }
 0x655   :  { %2532 = vst.msk [vmem:[#allocation8 + $0x47] sm:$0x1] %vm1040_vm12, %v2509_v1 }
 0x656   :  { %v2511_v58 = vpop.permute.xlu0 %2510 }
 0x657   :  { %2533 = vst.msk [vmem:[#allocation8 + $0x4f] sm:$0x1] %vm1040_vm12, %v2511_v58 }
 0x658   :  { %v2321_v2 = vpop.permute.xlu1 %2320 }
 0x659   :  { %2342 = vst.msk [vmem:[#allocation8 + $0x51] sm:$0x1] %vm1040_vm12, %v2321_v2 }
 0x65a   :  { %v2323_v3 = vpop.permute.xlu0 %2322 }
 0x65b   :  { %2343 = vst.msk [vmem:[#allocation8 + $0x59] sm:$0x1] %vm1040_vm12, %v2323_v3 }
 0x65c   :  { %v2325_v4 = vpop.permute.xlu1 %2324 }
 0x65d   :  { %2344 = vst.msk [vmem:[#allocation8 + $0x61] sm:$0x1] %vm1040_vm12, %v2325_v4 }
 0x65e   :  { %v2327_v5 = vpop.permute.xlu0 %2326 }
 0x65f   :  { %2345 = vst.msk [vmem:[#allocation8 + $0x69] sm:$0x1] %vm1040_vm12, %v2327_v5 }
 0x660   :  { %v2353_v8 = vpop.permute.xlu1 %2352 }
 0x661   :  { %2374 = vst.msk [vmem:[#allocation8 + $0x52] sm:$0x1] %vm1040_vm12, %v2353_v8 }
 0x662   :  { %v2355_v9 = vpop.permute.xlu0 %2354 }
 0x663   :  { %2375 = vst.msk [vmem:[#allocation8 + $0x5a] sm:$0x1] %vm1040_vm12, %v2355_v9 }
 0x664   :  { %v2357_v10 = vpop.permute.xlu1 %2356 }
 0x665   :  { %2376 = vst.msk [vmem:[#allocation8 + $0x62] sm:$0x1] %vm1040_vm12, %v2357_v10 }
 0x666   :  { %v2359_v11 = vpop.permute.xlu0 %2358 }
 0x667   :  { %2377 = vst.msk [vmem:[#allocation8 + $0x6a] sm:$0x1] %vm1040_vm12, %v2359_v11 }
 0x668   :  { %v2385_v12 = vpop.permute.xlu1 %2384 }
 0x669   :  { %2406 = vst.msk [vmem:[#allocation8 + $0x53] sm:$0x1] %vm1040_vm12, %v2385_v12 }
 0x66a   :  { %v2387_v14 = vpop.permute.xlu0 %2386 }
 0x66b   :  { %2407 = vst.msk [vmem:[#allocation8 + $0x5b] sm:$0x1] %vm1040_vm12, %v2387_v14 }
 0x66c   :  { %v2389_v17 = vpop.permute.xlu1 %2388 }
 0x66d   :  { %2408 = vst.msk [vmem:[#allocation8 + $0x63] sm:$0x1] %vm1040_vm12, %v2389_v17 }
 0x66e   :  { %v2391_v44 = vpop.permute.xlu0 %2390 }
 0x66f   :  { %2409 = vst.msk [vmem:[#allocation8 + $0x6b] sm:$0x1] %vm1040_vm12, %v2391_v44 }
 0x670   :  { %v2417_v18 = vpop.permute.xlu1 %2416 }
 0x671   :  { %2438 = vst.msk [vmem:[#allocation8 + $0x54] sm:$0x1] %vm1040_vm12, %v2417_v18 }
 0x672   :  { %v2419_v19 = vpop.permute.xlu0 %2418 }
 0x673   :  { %2439 = vst.msk [vmem:[#allocation8 + $0x5c] sm:$0x1] %vm1040_vm12, %v2419_v19 }
 0x674   :  { %v2421_v20 = vpop.permute.xlu1 %2420 }
 0x675   :  { %2440 = vst.msk [vmem:[#allocation8 + $0x64] sm:$0x1] %vm1040_vm12, %v2421_v20 }
 0x676   :  { %v2423_v21 = vpop.permute.xlu0 %2422 }
 0x677   :  { %2441 = vst.msk [vmem:[#allocation8 + $0x6c] sm:$0x1] %vm1040_vm12, %v2423_v21 }
 0x678   :  { %v2449_v22 = vpop.permute.xlu1 %2448 }
 0x679   :  { %2470 = vst.msk [vmem:[#allocation8 + $0x55] sm:$0x1] %vm1040_vm12, %v2449_v22 }
 0x67a   :  { %v2451_v23 = vpop.permute.xlu0 %2450 }
 0x67b   :  { %2471 = vst.msk [vmem:[#allocation8 + $0x5d] sm:$0x1] %vm1040_vm12, %v2451_v23 }
 0x67c   :  { %v2453_v7 = vpop.permute.xlu1 %2452 }
 0x67d   :  { %2472 = vst.msk [vmem:[#allocation8 + $0x65] sm:$0x1] %vm1040_vm12, %v2453_v7 }
 0x67e   :  { %v2455_v24 = vpop.permute.xlu0 %2454 }
 0x67f   :  { %2473 = vst.msk [vmem:[#allocation8 + $0x6d] sm:$0x1] %vm1040_vm12, %v2455_v24 }
 0x680   :  { %v2481_v25 = vpop.permute.xlu1 %2480 }
 0x681   :  { %2502 = vst.msk [vmem:[#allocation8 + $0x56] sm:$0x1] %vm1040_vm12, %v2481_v25 }
 0x682   :  { %v2483_v26 = vpop.permute.xlu0 %2482 }
 0x683   :  { %2503 = vst.msk [vmem:[#allocation8 + $0x5e] sm:$0x1] %vm1040_vm12, %v2483_v26 }
 0x684   :  { %v2485_v27 = vpop.permute.xlu1 %2484 }
 0x685   :  { %2504 = vst.msk [vmem:[#allocation8 + $0x66] sm:$0x1] %vm1040_vm12, %v2485_v27 }
 0x686   :  { %v2487_v28 = vpop.permute.xlu0 %2486 }
 0x687   :  { %2505 = vst.msk [vmem:[#allocation8 + $0x6e] sm:$0x1] %vm1040_vm12, %v2487_v28 }
 0x688   :  { %v2513_v29 = vpop.permute.xlu1 %2512 }
 0x689   :  { %2534 = vst.msk [vmem:[#allocation8 + $0x57] sm:$0x1] %vm1040_vm12, %v2513_v29 }
 0x68a   :  { %v2515_v30 = vpop.permute.xlu0 %2514 }
 0x68b   :  { %2535 = vst.msk [vmem:[#allocation8 + $0x5f] sm:$0x1] %vm1040_vm12, %v2515_v30 }
 0x68c   :  { %v2517_v31 = vpop.permute.xlu1 %2516 }
 0x68d   :  { %2536 = vst.msk [vmem:[#allocation8 + $0x67] sm:$0x1] %vm1040_vm12, %v2517_v31 }
 0x68e   :  { %v2519_v32 = vpop.permute.xlu0 %2518 }
 0x68f   :  { %2537 = vst.msk [vmem:[#allocation8 + $0x6f] sm:$0x1] %vm1040_vm12, %v2519_v32 }
 0x690   :  { %v2329_v33 = vpop.permute.xlu1 %2328 }
 0x691   :  { %2346 = vst.msk [vmem:[#allocation8 + $0x71] sm:$0x1] %vm1040_vm12, %v2329_v33 }
 0x692   :  { %v2331_v16 = vpop.permute.xlu0 %2330 }
 0x693   :  { %2347 = vst.msk [vmem:[#allocation8 + $0x79] sm:$0x1] %vm1040_vm12, %v2331_v16 }
 0x694   :  { %v2361_v34 = vpop.permute.xlu1 %2360 }
 0x695   :  { %2378 = vst.msk [vmem:[#allocation8 + $0x72] sm:$0x1] %vm1040_vm12, %v2361_v34 }
 0x696   :  { %v2363_v35 = vpop.permute.xlu0 %2362 }
 0x697   :  { %2379 = vst.msk [vmem:[#allocation8 + $0x7a] sm:$0x1] %vm1040_vm12, %v2363_v35 }
 0x698   :  { %v2393_v36 = vpop.permute.xlu1 %2392 }
 0x699   :  { %2410 = vst.msk [vmem:[#allocation8 + $0x73] sm:$0x1] %vm1040_vm12, %v2393_v36 }
 0x69a   :  { %v2395_v37 = vpop.permute.xlu0 %2394 }
 0x69b   :  { %2411 = vst.msk [vmem:[#allocation8 + $0x7b] sm:$0x1] %vm1040_vm12, %v2395_v37 }
 0x69c   :  { %v2425_v38 = vpop.permute.xlu1 %2424 }
 0x69d   :  { %2442 = vst.msk [vmem:[#allocation8 + $0x74] sm:$0x1] %vm1040_vm12, %v2425_v38 }
 0x69e   :  { %v2427_v39 = vpop.permute.xlu0 %2426 }
 0x69f   :  { %2443 = vst.msk [vmem:[#allocation8 + $0x7c] sm:$0x1] %vm1040_vm12, %v2427_v39 }
 0x6a0   :  { %v2457_v40 = vpop.permute.xlu1 %2456 }
 0x6a1   :  { %2474 = vst.msk [vmem:[#allocation8 + $0x75] sm:$0x1] %vm1040_vm12, %v2457_v40 }
 0x6a2   :  { %v2459_v41 = vpop.permute.xlu0 %2458 }
 0x6a3   :  { %2475 = vst.msk [vmem:[#allocation8 + $0x7d] sm:$0x1] %vm1040_vm12, %v2459_v41 }
 0x6a4   :  { %v2489_v42 = vpop.permute.xlu1 %2488 }
 0x6a5   :  { %2506 = vst.msk [vmem:[#allocation8 + $0x76] sm:$0x1] %vm1040_vm12, %v2489_v42 }
 0x6a6   :  { %v2491_v43 = vpop.permute.xlu0 %2490 }
 0x6a7   :  { %2507 = vst.msk [vmem:[#allocation8 + $0x7e] sm:$0x1] %vm1040_vm12, %v2491_v43 }
 0x6a8   :  { %v2521_v45 = vpop.permute.xlu1 %2520 }
 0x6a9   :  { %2538 = vst.msk [vmem:[#allocation8 + $0x77] sm:$0x1] %vm1040_vm12, %v2521_v45 }
 0x6aa   :  { %v2523_v51 = vpop.permute.xlu0 %2522 }
 0x6ab   :  { %2539 = vst.msk [vmem:[#allocation8 + $0x7f] sm:$0x1] %vm1040_vm12, %v2523_v51 }
 0x6ac   :  { %2861 = shalt.err (!%p2858_p6)
}
 0x6ad   :  { %s2862_s21 = scalar_lea.hbm %s3621_s4, 2048 }
 0x6ae   :  { %p2863_p7 = scmp.ne.s32.totalorder %s3621_s4, %s2862_s21  ;;  %p2866_p8 = scmp.lt.u32.totalorder %s2862_s21, %s3621_s4 }
 0x6b0   :  { %p2868_p9 = pnand %p2866_p8, %p2863_p7 }
 0x6b2   :  { %2871 = shalt.err (!%p2868_p9)
}
 0x6b3   :  { %2551 = dma.vmem_to_hbm [thread:$0]  %s2546_s17, 2048, %s3621_s4, [#allocation5], %s2879_s25, %s2879_s25, %s2880_s26  }
 0x6b4   :  { %2876 = dma.done.wait [#allocation5], 2048  }
 0x6b5   :  { %2877 = vsyncadd [#allocation5], 4294965248 }
 0x6b6   :  { %2555 = vsyncpa [#allocation4], 1 }
 0x6b7   :  { %2556 = vsyncpa [#allocation7], 1 }
 0x6b8   :  { %2557 = vsyncpa [#allocation5], 1 }

</bundles_post_ra>
